<compile_context>
chip_gen: v7x
topology: tpu7x:2x2x1
jax: 0.10.0
libtpu: 0.0.40
codegen_flags: <defaults>
</compile_context>

<pallas_src>
import math

import jax
import jax.numpy as jnp
from jax.experimental import pallas as pl
from jax.experimental.pallas import tpu as pltpu  # noqa: F401  (TPU backend)

# ---- model hyper-parameters (consistent with Mamba defaults) -------------
D_MODEL = 32
EXPAND = 2
D_INNER = EXPAND * D_MODEL            # 64
D_STATE = 16
D_CONV = 4
DT_RANK = math.ceil(D_MODEL / 16)     # 2
SEQLEN = 8
BATCH = 2
IF_DEVIDE_OUT = True                  # out_proj((out + out_b.flip)/2)

DI = D_INNER                          # 64
DI2 = 2 * D_INNER                     # 128  (forward lanes | backward lanes)
NS = D_STATE                          # 16
L = SEQLEN                            # 8
LN = SEQLEN * D_STATE                 # 128  (time-major flattened state rows)
NTAP = 2 * D_CONV - 1                 # 7 fused conv taps (causal + anti-causal)

# fused x_proj output column layout
_DT_OFF = 0                           # [0,128)   dt (fwd | bwd), bias folded in
_CF_OFF = DI2                         # [128,256) C_fwd tiled L times
_CB_OFF = DI2 + LN                    # [256,384) C_bwd tiled L times
_BF_OFF = DI2 + 2 * LN                # [384,400) B_fwd
_BB_OFF = _BF_OFF + NS                # [400,416) B_bwd
_XPROJ_COLS = _BB_OFF + NS            # 416

# scan slab row layout
_A_ROW = 0                            # rows [0,16): A^T (fwd | bwd)
_D_ROW = NS                           # row  16:     D   (fwd | bwd)
_MASK_ROW = NS + 1                    # rows [17,25): block-diag expansion mask
_SCAN_ROWS = _MASK_ROW + L            # 25


def _softplus(x):
    # matches torch.nn.Softplus(beta=1, threshold=20)
    return jnp.where(x > 20.0, x, jnp.log1p(jnp.exp(jnp.minimum(x, 20.0))))


def _silu(x):
    return x * (1.0 / (1.0 + jnp.exp(-x)))


# ------------------------------- kernel -----------------------------------
def _mamba_kernel(h_ref, win_ref, conv_ref, xproj_ref, scan_ref, outw_ref,
                  out_ref):
    B = BATCH
    BL = B * L

    # ---------------- in_proj: (B*L, 32) @ (32, 128) ----------------------
    h2 = h_ref[...]                                                    # (16,32)
    w_in = win_ref[0:D_MODEL, :]
    b_in = win_ref[D_MODEL:D_MODEL + 1, :]
    xz = jnp.dot(h2, w_in, preferred_element_type=jnp.float32) + b_in  # (16,128)
    x_seq = xz[:, :DI]                                                 # (16,64)
    z_seq = xz[:, DI:]                                                 # (16,64)

    # ------- fused bidirectional depthwise conv (7 taps, no flips) --------
    # lanes [0,64):  causal conv with forward taps
    # lanes [64,128): anti-causal conv with reversed backward taps
    # both expressed in ORIGINAL time order; batch handled via per-batch pad.
    x2 = jnp.concatenate([x_seq, x_seq], axis=1).reshape(B, L, DI2)
    zpad = jnp.zeros((B, D_CONV - 1, DI2), jnp.float32)
    xp = jnp.concatenate([zpad, x2, zpad], axis=1)          # (B, L+2K-2, 128)
    acc = jnp.broadcast_to(conv_ref[NTAP:NTAP + 1, :].reshape(1, 1, DI2),
                           (B, L, DI2))                     # conv bias
    for o in range(NTAP):                                   # static unroll
        acc = acc + xp[:, o:o + L, :] * conv_ref[o:o + 1, :].reshape(1, 1, DI2)
    xc = _silu(acc).reshape(BL, DI2)                        # (16,128)

    # ------ fused x_proj + folded dt_proj: one (16,128)@(128,416) ---------
    w_x = xproj_ref[0:DI2, :]
    b_x = xproj_ref[DI2:DI2 + 1, :]
    proj = jnp.dot(xc, w_x, preferred_element_type=jnp.float32) + b_x  # (16,416)

    dt = _softplus(proj[:, _DT_OFF:_DT_OFF + DI2])          # (16,128)
    cf_t = proj[:, _CF_OFF:_CF_OFF + LN]                    # (16,128) C_f tiled
    cb_t = proj[:, _CB_OFF:_CB_OFF + LN]                    # (16,128) C_b tiled
    b_f = proj[:, _BF_OFF:_BF_OFF + NS]                     # (16,16)
    b_b = proj[:, _BB_OFF:_BB_OFF + NS]                     # (16,16)

    # --------------- discretization (d_inner on lanes) --------------------
    a_t = scan_ref[_A_ROW:_A_ROW + NS, :]                   # (16,128) = A^T f|b
    d_all = scan_ref[_D_ROW:_D_ROW + 1, :]                  # (1,128)
    blkmask = scan_ref[_MASK_ROW:_MASK_ROW + L, :]          # (8,128) precomputed

    dt4 = dt.reshape(B, L, 1, DI2)
    da_all = jnp.exp(dt4 * a_t.reshape(1, 1, NS, DI2))      # (B,L,16,128) EUP
    da_f = da_all[..., :DI]                                 # (B,L,16,64)
    da_b = da_all[..., DI:]

    udt = dt * xc                                           # (16,128)
    dbu_f = (udt[:, :DI].reshape(B, L, 1, DI)
             * b_f.reshape(B, L, NS)[..., None])            # (B,L,16,64)
    dbu_b = (udt[:, DI:].reshape(B, L, 1, DI)
             * b_b.reshape(B, L, NS)[..., None])

    # --------- sequential selective scan (fwd + time-reversed bwd) --------
    state_f = jnp.zeros((B, NS, DI), jnp.float32)
    state_b = jnp.zeros((B, NS, DI), jnp.float32)
    states_f = []
    states_b = [None] * L
    for s in range(L):                                      # static unroll, L=8
        state_f = da_f[:, s] * state_f + dbu_f[:, s]
        states_f.append(state_f)
        m = L - 1 - s                                       # backward scan order
        state_b = da_b[:, m] * state_b + dbu_b[:, m]
        states_b[m] = state_b                               # stored in orig order
    s_f = jnp.stack(states_f, axis=1).reshape(B, LN, DI)    # row = t*16 + n
    s_b = jnp.stack(states_b, axis=1).reshape(B, LN, DI)

    # ---- y[t,d] = sum_n C[t,n]*state_t[n,d]  as one MXU matmul per dir ----
    m_f = cf_t.reshape(B, L, LN) * blkmask                  # block-diag expanded C
    m_b = cb_t.reshape(B, L, LN) * blkmask

    rows = []
    for b in range(B):                                      # static unroll, B=2
        yf = jnp.dot(m_f[b], s_f[b], preferred_element_type=jnp.float32)  # (8,64)
        yb = jnp.dot(m_b[b], s_b[b], preferred_element_type=jnp.float32)  # (8,64)
        rows.append(jnp.concatenate([yf, yb], axis=1))      # (8,128)
    y_dir = jnp.concatenate(rows, axis=0)                   # (16,128)

    # D skip, SiLU(z) gate, direction sum, out_proj (0.5 folded into weight)
    y_dir = y_dir + xc * d_all
    comb = (y_dir[:, :DI] + y_dir[:, DI:]) * _silu(z_seq)   # (16,64)
    w_o = outw_ref[0:DI, :]
    b_o = outw_ref[DI:DI + 1, :]
    out_ref[...] = (jnp.dot(comb, w_o, preferred_element_type=jnp.float32)
                    + b_o)                                  # (16,32)


# ------------------- host-side parameter fusion (5 slabs) ------------------
def _build_slabs(p):
    f32 = jnp.float32
    zeros = jnp.zeros
    K = D_CONV

    # in_proj slab: rows [0:32] weight, row 32 bias -> (33, 128)
    win_s = jnp.concatenate([p["w_in"], p["b_in"]], axis=0)

    # fused bidirectional conv slab: 7 taps + bias row -> (8, 128)
    taps = []
    for o in range(NTAP):                     # relative shift r = o - (K-1)
        fwd = p["conv_w_f"][o] if o <= K - 1 else zeros((DI,), f32)
        bwd = (p["conv_w_b"][2 * (K - 1) - o] if o >= K - 1
               else zeros((DI,), f32))
        taps.append(jnp.concatenate([fwd, bwd])[None, :])
    conv_bias = jnp.concatenate([p["conv_b_f"], p["conv_b_b"]], axis=1)
    conv_s = jnp.concatenate(taps + [conv_bias], axis=0)

    # fused x_proj / dt_proj slab -> (129, 416)
    w_dt_f = p["w_xdt_f"] @ p["w_dtp_f"]      # dt_proj folded into x_proj
    w_dt_b = p["w_xdt_b"] @ p["w_dtp_b"]
    z64 = zeros((DI, DI), f32)
    col_dt = jnp.concatenate(
        [jnp.concatenate([w_dt_f, z64], axis=1),
         jnp.concatenate([z64, w_dt_b], axis=1)], axis=0)            # (128,128)
    col_cf = jnp.concatenate([jnp.tile(p["w_xC_f"], (1, L)),
                              zeros((DI, LN), f32)], axis=0)         # (128,128)
    col_cb = jnp.concatenate([zeros((DI, LN), f32),
                              jnp.tile(p["w_xC_b"], (1, L))], axis=0)
    col_bf = jnp.concatenate([p["w_xB_f"], zeros((DI, NS), f32)], axis=0)
    col_bb = jnp.concatenate([zeros((DI, NS), f32), p["w_xB_b"]], axis=0)
    w_x = jnp.concatenate([col_dt, col_cf, col_cb, col_bf, col_bb], axis=1)
    b_x = jnp.concatenate([p["b_dtp_f"], p["b_dtp_b"],
                           zeros((1, _XPROJ_COLS - DI2), f32)], axis=1)
    xproj_s = jnp.concatenate([w_x, b_x], axis=0)

    # scan slab: A^T rows [0:16], D row 16, block-diag mask rows [17:25]
    a_t = jnp.concatenate([(-jnp.exp(p["A_log_f"])).T,
                           (-jnp.exp(p["A_log_b"])).T], axis=1)      # (16,128)
    d_all = jnp.concatenate([p["D_f"], p["D_b"]], axis=1)            # (1,128)
    t_idx = jnp.arange(L, dtype=jnp.int32)[:, None]
    j_idx = jnp.arange(LN, dtype=jnp.int32)[None, :]
    blkmask = ((j_idx // NS) == t_idx).astype(f32)                   # (8,128)
    scan_s = jnp.concatenate([a_t, d_all, blkmask], axis=0)          # (25,128)

    # out_proj slab (the bidirectional /2 folded into the weight) -> (65, 32)
    w_out = p["w_out"] * (0.5 if IF_DEVIDE_OUT else 1.0)
    out_s = jnp.concatenate([w_out, p["b_out"]], axis=0)

    return win_s, conv_s, xproj_s, scan_s, out_s


@jax.jit
def modified_mamba_forward(hidden_states, params):
    B, Lx, D = hidden_states.shape
    assert B == BATCH and Lx == SEQLEN and D == D_MODEL
    slabs = _build_slabs(params)
    h2d = hidden_states.reshape(B * Lx, D)        # free bitcast in XLA
    out2d = pl.pallas_call(
        _mamba_kernel,
        out_shape=jax.ShapeDtypeStruct((B * Lx, D), jnp.float32),
    )(h2d, *slabs)
    return out2d.reshape(B, Lx, D)


# ---------------------- deterministic parameter init ----------------------
def init_params(key):
    ks = list(jax.random.split(key, 20))

    def rnd(shape, scale=0.1):
        return jax.random.normal(ks.pop(), shape, jnp.float32) * scale

    p = {}
    # in_proj: Linear(d_model -> 2*d_inner)
    p["w_in"] = rnd((D_MODEL, 2 * D_INNER))
    p["b_in"] = jnp.zeros((1, 2 * D_INNER), jnp.float32)

    # A initialized like Mamba: A[d, n] = n+1 ;  A_log = log(A)
    A_init = jnp.tile(jnp.arange(1, D_STATE + 1, dtype=jnp.float32)[None, :],
                      (D_INNER, 1))

    for tag in ("f", "b"):
        p[f"conv_w_{tag}"] = rnd((D_CONV, D_INNER))      # depthwise conv (K, d_inner)
        p[f"conv_b_{tag}"] = rnd((1, D_INNER))
        p[f"w_xdt_{tag}"] = rnd((D_INNER, DT_RANK))      # x_proj rows for dt
        p[f"w_xB_{tag}"] = rnd((D_INNER, D_STATE))       # x_proj rows for B
        p[f"w_xC_{tag}"] = rnd((D_INNER, D_STATE))       # x_proj rows for C
        p[f"w_dtp_{tag}"] = rnd((DT_RANK, D_INNER))      # dt_proj weight^T
        p[f"b_dtp_{tag}"] = rnd((1, D_INNER))            # dt_proj bias
        p[f"A_log_{tag}"] = jnp.log(A_init)
        p[f"D_{tag}"] = jnp.ones((1, D_INNER), jnp.float32)

    # out_proj: Linear(d_inner -> d_model)
    p["w_out"] = rnd((D_INNER, D_MODEL))
    p["b_out"] = jnp.zeros((1, D_MODEL), jnp.float32)
    return p


# --------------------------- pure-JAX reference ----------------------------
def reference_forward(h, p):
    B, Lr, D = h.shape
    xz = h @ p["w_in"] + p["b_in"]                       # (B, L, 2*d_inner)
    x_all = xz[..., :D_INNER]
    z_all = xz[..., D_INNER:]

    def direction(x, z, cw, cb, wdt, wB, wC, wp, bp, A_log, Dp):
        xp = jnp.pad(x, ((0, 0), (D_CONV - 1, 0), (0, 0)))
        acc = jnp.zeros_like(x) + cb
        for k in range(D_CONV):
            acc = acc + xp[:, k:k + Lr, :] * cw[k]
        xc = _silu(acc)
        dt_low = xc @ wdt
        Bm = xc @ wB
        Cm = xc @ wC
        dt = _softplus(dt_low @ wp + bp)
        A = -jnp.exp(A_log)
        deltaA = jnp.exp(dt[..., None] * A[None, None])
        deltaBu = (dt * xc)[..., None] * Bm[:, :, None, :]
        state = jnp.zeros((B, D_INNER, D_STATE), jnp.float32)
        ys = []
        for i in range(Lr):
            state = deltaA[:, i] * state + deltaBu[:, i]
            ys.append(jnp.einsum("bdn,bn->bd", state, Cm[:, i]))
        y = jnp.stack(ys, axis=1) + xc * Dp
        return y * _silu(z)

    y_f = direction(x_all, z_all,
                    p["conv_w_f"], p["conv_b_f"], p["w_xdt_f"], p["w_xB_f"],
                    p["w_xC_f"], p["w_dtp_f"], p["b_dtp_f"], p["A_log_f"],
                    p["D_f"])
    y_b = direction(x_all[:, ::-1], z_all[:, ::-1],
                    p["conv_w_b"], p["conv_b_b"], p["w_xdt_b"], p["w_xB_b"],
                    p["w_xC_b"], p["w_dtp_b"], p["b_dtp_b"], p["A_log_b"],
                    p["D_b"])
    comb = y_f + y_b[:, ::-1]
    if IF_DEVIDE_OUT:
        comb = comb * 0.5
    return comb @ p["w_out"] + p["b_out"]


if __name__ == "__main__":
    key = jax.random.PRNGKey(0)
    k_h, k_p = jax.random.split(key)
    hidden_states = jax.random.normal(k_h, (BATCH, SEQLEN, D_MODEL), jnp.float32)
    params = init_params(k_p)

    out = modified_mamba_forward(hidden_states, params)
    out = jax.block_until_ready(out)
    assert out.shape == (BATCH, SEQLEN, D_MODEL)

    ref = reference_forward(hidden_states, params)
    if not bool(jnp.allclose(out, ref, rtol=1e-2, atol=1e-2)):
        raise AssertionError("Pallas kernel output does not match reference")

    print("KERNEL_OK")
</pallas_src>

<mosaic_0001>
module attributes {stable_mosaic.version = 11 : i64} {
  func.func @_mamba_kernel(%arg0: memref<16x32xf32, #tpu.memory_space<vmem>>, %arg1: memref<33x128xf32, #tpu.memory_space<vmem>>, %arg2: memref<8x128xf32, #tpu.memory_space<vmem>>, %arg3: memref<129x416xf32, #tpu.memory_space<vmem>>, %arg4: memref<25x128xf32, #tpu.memory_space<vmem>>, %arg5: memref<65x32xf32, #tpu.memory_space<vmem>>, %arg6: memref<16x32xf32, #tpu.memory_space<vmem>>) attributes {dimension_semantics = [], scalar_prefetch = 0 : i64, scratch_operands = 0 : i64, tpu.core_type = #tpu.core_type<tc>} {
    %c0 = arith.constant 0 : index
    %c0_0 = arith.constant 0 : index
    %0 = vector.load %arg0[%c0, %c0_0] : memref<16x32xf32, #tpu.memory_space<vmem>>, vector<16x32xf32>
    %c0_1 = arith.constant 0 : index
    %c0_2 = arith.constant 0 : index
    %1 = vector.load %arg1[%c0_1, %c0_2] : memref<33x128xf32, #tpu.memory_space<vmem>>, vector<32x128xf32>
    %c32 = arith.constant 32 : index
    %c0_3 = arith.constant 0 : index
    %2 = vector.load %arg1[%c32, %c0_3] : memref<33x128xf32, #tpu.memory_space<vmem>>, vector<1x128xf32>
    %cst = arith.constant dense<0.000000e+00> : vector<16x128xf32>
    %3 = tpu.matmul %0, %1, %cst {dimension_numbers = #tpu.dot_dimension_numbers<[1], [0], [0], [1], [0, 0, 1, 1], [], []>} : vector<16x32xf32>, vector<32x128xf32>, vector<16x128xf32> -> vector<16x128xf32>
    %4 = vector.broadcast %2 : vector<1x128xf32> to vector<16x128xf32>
    %5 = arith.addf %3, %4 : vector<16x128xf32>
    %6 = vector.extract_strided_slice %5 {offsets = [0, 0], sizes = [16, 64], strides = [1, 1]} : vector<16x128xf32> to vector<16x64xf32>
    %7 = vector.extract_strided_slice %5 {offsets = [0, 64], sizes = [16, 64], strides = [1, 1]} : vector<16x128xf32> to vector<16x64xf32>
    %8 = tpu.concatenate %6, %6 in 1 : vector<16x64xf32>, vector<16x64xf32> -> vector<16x128xf32>
    %9 = vector.shape_cast %8 : vector<16x128xf32> to vector<2x8x128xf32>
    %cst_4 = arith.constant 0.000000e+00 : f32
    %10 = vector.broadcast %cst_4 : f32 to vector<2x3x128xf32>
    %11 = tpu.concatenate %10, %9, %10 in 1 : vector<2x3x128xf32>, vector<2x8x128xf32>, vector<2x3x128xf32> -> vector<2x14x128xf32>
    %c7 = arith.constant 7 : index
    %c0_5 = arith.constant 0 : index
    %12 = vector.load %arg2[%c7, %c0_5] : memref<8x128xf32, #tpu.memory_space<vmem>>, vector<1x128xf32>
    %13 = vector.shape_cast %12 : vector<1x128xf32> to vector<1x1x128xf32>
    %14 = vector.shape_cast %13 : vector<1x1x128xf32> to vector<1x1x128xf32>
    %15 = vector.broadcast %14 : vector<1x1x128xf32> to vector<2x8x128xf32>
    %16 = vector.extract_strided_slice %11 {offsets = [0, 0, 0], sizes = [2, 8, 128], strides = [1, 1, 1]} : vector<2x14x128xf32> to vector<2x8x128xf32>
    %c0_6 = arith.constant 0 : index
    %c0_7 = arith.constant 0 : index
    %17 = vector.load %arg2[%c0_6, %c0_7] : memref<8x128xf32, #tpu.memory_space<vmem>>, vector<1x128xf32>
    %18 = vector.shape_cast %17 : vector<1x128xf32> to vector<1x1x128xf32>
    %19 = vector.broadcast %18 : vector<1x1x128xf32> to vector<2x8x128xf32>
    %20 = arith.mulf %16, %19 : vector<2x8x128xf32>
    %21 = arith.addf %15, %20 : vector<2x8x128xf32>
    %22 = vector.extract_strided_slice %11 {offsets = [0, 1, 0], sizes = [2, 8, 128], strides = [1, 1, 1]} : vector<2x14x128xf32> to vector<2x8x128xf32>
    %c1 = arith.constant 1 : index
    %c0_8 = arith.constant 0 : index
    %23 = vector.load %arg2[%c1, %c0_8] : memref<8x128xf32, #tpu.memory_space<vmem>>, vector<1x128xf32>
    %24 = vector.shape_cast %23 : vector<1x128xf32> to vector<1x1x128xf32>
    %25 = vector.broadcast %24 : vector<1x1x128xf32> to vector<2x8x128xf32>
    %26 = arith.mulf %22, %25 : vector<2x8x128xf32>
    %27 = arith.addf %21, %26 : vector<2x8x128xf32>
    %28 = vector.extract_strided_slice %11 {offsets = [0, 2, 0], sizes = [2, 8, 128], strides = [1, 1, 1]} : vector<2x14x128xf32> to vector<2x8x128xf32>
    %c2 = arith.constant 2 : index
    %c0_9 = arith.constant 0 : index
    %29 = vector.load %arg2[%c2, %c0_9] : memref<8x128xf32, #tpu.memory_space<vmem>>, vector<1x128xf32>
    %30 = vector.shape_cast %29 : vector<1x128xf32> to vector<1x1x128xf32>
    %31 = vector.broadcast %30 : vector<1x1x128xf32> to vector<2x8x128xf32>
    %32 = arith.mulf %28, %31 : vector<2x8x128xf32>
    %33 = arith.addf %27, %32 : vector<2x8x128xf32>
    %34 = vector.extract_strided_slice %11 {offsets = [0, 3, 0], sizes = [2, 8, 128], strides = [1, 1, 1]} : vector<2x14x128xf32> to vector<2x8x128xf32>
    %c3 = arith.constant 3 : index
    %c0_10 = arith.constant 0 : index
    %35 = vector.load %arg2[%c3, %c0_10] : memref<8x128xf32, #tpu.memory_space<vmem>>, vector<1x128xf32>
    %36 = vector.shape_cast %35 : vector<1x128xf32> to vector<1x1x128xf32>
    %37 = vector.broadcast %36 : vector<1x1x128xf32> to vector<2x8x128xf32>
    %38 = arith.mulf %34, %37 : vector<2x8x128xf32>
    %39 = arith.addf %33, %38 : vector<2x8x128xf32>
    %40 = vector.extract_strided_slice %11 {offsets = [0, 4, 0], sizes = [2, 8, 128], strides = [1, 1, 1]} : vector<2x14x128xf32> to vector<2x8x128xf32>
    %c4 = arith.constant 4 : index
    %c0_11 = arith.constant 0 : index
    %41 = vector.load %arg2[%c4, %c0_11] : memref<8x128xf32, #tpu.memory_space<vmem>>, vector<1x128xf32>
    %42 = vector.shape_cast %41 : vector<1x128xf32> to vector<1x1x128xf32>
    %43 = vector.broadcast %42 : vector<1x1x128xf32> to vector<2x8x128xf32>
    %44 = arith.mulf %40, %43 : vector<2x8x128xf32>
    %45 = arith.addf %39, %44 : vector<2x8x128xf32>
    %46 = vector.extract_strided_slice %11 {offsets = [0, 5, 0], sizes = [2, 8, 128], strides = [1, 1, 1]} : vector<2x14x128xf32> to vector<2x8x128xf32>
    %c5 = arith.constant 5 : index
    %c0_12 = arith.constant 0 : index
    %47 = vector.load %arg2[%c5, %c0_12] : memref<8x128xf32, #tpu.memory_space<vmem>>, vector<1x128xf32>
    %48 = vector.shape_cast %47 : vector<1x128xf32> to vector<1x1x128xf32>
    %49 = vector.broadcast %48 : vector<1x1x128xf32> to vector<2x8x128xf32>
    %50 = arith.mulf %46, %49 : vector<2x8x128xf32>
    %51 = arith.addf %45, %50 : vector<2x8x128xf32>
    %52 = vector.extract_strided_slice %11 {offsets = [0, 6, 0], sizes = [2, 8, 128], strides = [1, 1, 1]} : vector<2x14x128xf32> to vector<2x8x128xf32>
    %c6 = arith.constant 6 : index
    %c0_13 = arith.constant 0 : index
    %53 = vector.load %arg2[%c6, %c0_13] : memref<8x128xf32, #tpu.memory_space<vmem>>, vector<1x128xf32>
    %54 = vector.shape_cast %53 : vector<1x128xf32> to vector<1x1x128xf32>
    %55 = vector.broadcast %54 : vector<1x1x128xf32> to vector<2x8x128xf32>
    %56 = arith.mulf %52, %55 : vector<2x8x128xf32>
    %57 = arith.addf %51, %56 : vector<2x8x128xf32>
    %cst_14 = arith.constant 0.000000e+00 : f32
    %58 = vector.broadcast %cst_14 : f32 to vector<2x8x128xf32>
    %59 = arith.subf %58, %57 : vector<2x8x128xf32>
    %60 = math.exp %59 : vector<2x8x128xf32>
    %cst_15 = arith.constant 1.000000e+00 : f32
    %61 = vector.broadcast %cst_15 : f32 to vector<2x8x128xf32>
    %62 = arith.addf %61, %60 : vector<2x8x128xf32>
    %cst_16 = arith.constant 1.000000e+00 : f32
    %63 = vector.broadcast %cst_16 : f32 to vector<2x8x128xf32>
    %64 = arith.divf %63, %62 : vector<2x8x128xf32>
    %65 = arith.mulf %57, %64 : vector<2x8x128xf32>
    %66 = vector.shape_cast %65 : vector<2x8x128xf32> to vector<16x128xf32>
    %c0_17 = arith.constant 0 : index
    %c0_18 = arith.constant 0 : index
    %67 = vector.load %arg3[%c0_17, %c0_18] : memref<129x416xf32, #tpu.memory_space<vmem>>, vector<128x416xf32>
    %c128 = arith.constant 128 : index
    %c0_19 = arith.constant 0 : index
    %68 = vector.load %arg3[%c128, %c0_19] : memref<129x416xf32, #tpu.memory_space<vmem>>, vector<1x416xf32>
    %cst_20 = arith.constant dense<0.000000e+00> : vector<16x416xf32>
    %69 = tpu.matmul %66, %67, %cst_20 {dimension_numbers = #tpu.dot_dimension_numbers<[1], [0], [0], [1], [0, 0, 1, 1], [], []>} : vector<16x128xf32>, vector<128x416xf32>, vector<16x416xf32> -> vector<16x416xf32>
    %70 = vector.broadcast %68 : vector<1x416xf32> to vector<16x416xf32>
    %71 = arith.addf %69, %70 : vector<16x416xf32>
    %72 = vector.extract_strided_slice %71 {offsets = [0, 0], sizes = [16, 128], strides = [1, 1]} : vector<16x416xf32> to vector<16x128xf32>
    %cst_21 = arith.constant 2.000000e+01 : f32
    %73 = vector.broadcast %cst_21 : f32 to vector<16x128xf32>
    %74 = arith.cmpf ogt, %72, %73 : vector<16x128xf32>
    %cst_22 = arith.constant 2.000000e+01 : f32
    %75 = vector.broadcast %cst_22 : f32 to vector<16x128xf32>
    %76 = arith.minimumf %72, %75 : vector<16x128xf32>
    %77 = math.exp %76 : vector<16x128xf32>
    %78 = math.log1p %77 : vector<16x128xf32>
    %79 = arith.select %74, %72, %78 : vector<16x128xi1>, vector<16x128xf32>
    %80 = vector.extract_strided_slice %71 {offsets = [0, 128], sizes = [16, 128], strides = [1, 1]} : vector<16x416xf32> to vector<16x128xf32>
    %81 = vector.extract_strided_slice %71 {offsets = [0, 256], sizes = [16, 128], strides = [1, 1]} : vector<16x416xf32> to vector<16x128xf32>
    %82 = vector.extract_strided_slice %71 {offsets = [0, 384], sizes = [16, 16], strides = [1, 1]} : vector<16x416xf32> to vector<16x16xf32>
    %83 = vector.extract_strided_slice %71 {offsets = [0, 400], sizes = [16, 16], strides = [1, 1]} : vector<16x416xf32> to vector<16x16xf32>
    %c0_23 = arith.constant 0 : index
    %c0_24 = arith.constant 0 : index
    %84 = vector.load %arg4[%c0_23, %c0_24] : memref<25x128xf32, #tpu.memory_space<vmem>>, vector<16x128xf32>
    %c16 = arith.constant 16 : index
    %c0_25 = arith.constant 0 : index
    %85 = vector.load %arg4[%c16, %c0_25] : memref<25x128xf32, #tpu.memory_space<vmem>>, vector<1x128xf32>
    %c17 = arith.constant 17 : index
    %c0_26 = arith.constant 0 : index
    %86 = vector.load %arg4[%c17, %c0_26] : memref<25x128xf32, #tpu.memory_space<vmem>>, vector<8x128xf32>
    %87 = vector.shape_cast %79 : vector<16x128xf32> to vector<2x8x1x128xf32>
    %88 = vector.shape_cast %84 : vector<16x128xf32> to vector<1x1x16x128xf32>
    %89 = vector.broadcast %87 : vector<2x8x1x128xf32> to vector<2x8x16x128xf32>
    %90 = vector.broadcast %88 : vector<1x1x16x128xf32> to vector<2x8x16x128xf32>
    %91 = arith.mulf %89, %90 : vector<2x8x16x128xf32>
    %92 = math.exp %91 : vector<2x8x16x128xf32>
    %93 = vector.extract_strided_slice %92 {offsets = [0, 0, 0, 0], sizes = [2, 8, 16, 64], strides = [1, 1, 1, 1]} : vector<2x8x16x128xf32> to vector<2x8x16x64xf32>
    %94 = vector.extract_strided_slice %92 {offsets = [0, 0, 0, 64], sizes = [2, 8, 16, 64], strides = [1, 1, 1, 1]} : vector<2x8x16x128xf32> to vector<2x8x16x64xf32>
    %95 = arith.mulf %79, %66 : vector<16x128xf32>
    %96 = vector.extract_strided_slice %95 {offsets = [0, 0], sizes = [16, 64], strides = [1, 1]} : vector<16x128xf32> to vector<16x64xf32>
    %97 = vector.shape_cast %96 : vector<16x64xf32> to vector<2x8x1x64xf32>
    %98 = vector.shape_cast %82 : vector<16x16xf32> to vector<2x8x16xf32>
    %99 = vector.shape_cast %98 : vector<2x8x16xf32> to vector<2x8x16x1xf32>
    %100 = vector.broadcast %97 : vector<2x8x1x64xf32> to vector<2x8x16x64xf32>
    %101 = vector.broadcast %99 : vector<2x8x16x1xf32> to vector<2x8x16x64xf32>
    %102 = arith.mulf %100, %101 : vector<2x8x16x64xf32>
    %103 = vector.extract_strided_slice %95 {offsets = [0, 64], sizes = [16, 64], strides = [1, 1]} : vector<16x128xf32> to vector<16x64xf32>
    %104 = vector.shape_cast %103 : vector<16x64xf32> to vector<2x8x1x64xf32>
    %105 = vector.shape_cast %83 : vector<16x16xf32> to vector<2x8x16xf32>
    %106 = vector.shape_cast %105 : vector<2x8x16xf32> to vector<2x8x16x1xf32>
    %107 = vector.broadcast %104 : vector<2x8x1x64xf32> to vector<2x8x16x64xf32>
    %108 = vector.broadcast %106 : vector<2x8x16x1xf32> to vector<2x8x16x64xf32>
    %109 = arith.mulf %107, %108 : vector<2x8x16x64xf32>
    %cst_27 = arith.constant 0.000000e+00 : f32
    %110 = vector.broadcast %cst_27 : f32 to vector<2x16x64xf32>
    %cst_28 = arith.constant 0.000000e+00 : f32
    %111 = vector.broadcast %cst_28 : f32 to vector<2x16x64xf32>
    %112 = vector.extract_strided_slice %93 {offsets = [0, 0, 0, 0], sizes = [2, 1, 16, 64], strides = [1, 1, 1, 1]} : vector<2x8x16x64xf32> to vector<2x1x16x64xf32>
    %113 = vector.shape_cast %112 : vector<2x1x16x64xf32> to vector<2x16x64xf32>
    %114 = arith.mulf %113, %110 : vector<2x16x64xf32>
    %115 = vector.extract_strided_slice %102 {offsets = [0, 0, 0, 0], sizes = [2, 1, 16, 64], strides = [1, 1, 1, 1]} : vector<2x8x16x64xf32> to vector<2x1x16x64xf32>
    %116 = vector.shape_cast %115 : vector<2x1x16x64xf32> to vector<2x16x64xf32>
    %117 = arith.addf %114, %116 : vector<2x16x64xf32>
    %118 = vector.extract_strided_slice %94 {offsets = [0, 7, 0, 0], sizes = [2, 1, 16, 64], strides = [1, 1, 1, 1]} : vector<2x8x16x64xf32> to vector<2x1x16x64xf32>
    %119 = vector.shape_cast %118 : vector<2x1x16x64xf32> to vector<2x16x64xf32>
    %120 = arith.mulf %119, %111 : vector<2x16x64xf32>
    %121 = vector.extract_strided_slice %109 {offsets = [0, 7, 0, 0], sizes = [2, 1, 16, 64], strides = [1, 1, 1, 1]} : vector<2x8x16x64xf32> to vector<2x1x16x64xf32>
    %122 = vector.shape_cast %121 : vector<2x1x16x64xf32> to vector<2x16x64xf32>
    %123 = arith.addf %120, %122 : vector<2x16x64xf32>
    %124 = vector.extract_strided_slice %93 {offsets = [0, 1, 0, 0], sizes = [2, 1, 16, 64], strides = [1, 1, 1, 1]} : vector<2x8x16x64xf32> to vector<2x1x16x64xf32>
    %125 = vector.shape_cast %124 : vector<2x1x16x64xf32> to vector<2x16x64xf32>
    %126 = arith.mulf %125, %117 : vector<2x16x64xf32>
    %127 = vector.extract_strided_slice %102 {offsets = [0, 1, 0, 0], sizes = [2, 1, 16, 64], strides = [1, 1, 1, 1]} : vector<2x8x16x64xf32> to vector<2x1x16x64xf32>
    %128 = vector.shape_cast %127 : vector<2x1x16x64xf32> to vector<2x16x64xf32>
    %129 = arith.addf %126, %128 : vector<2x16x64xf32>
    %130 = vector.extract_strided_slice %94 {offsets = [0, 6, 0, 0], sizes = [2, 1, 16, 64], strides = [1, 1, 1, 1]} : vector<2x8x16x64xf32> to vector<2x1x16x64xf32>
    %131 = vector.shape_cast %130 : vector<2x1x16x64xf32> to vector<2x16x64xf32>
    %132 = arith.mulf %131, %123 : vector<2x16x64xf32>
    %133 = vector.extract_strided_slice %109 {offsets = [0, 6, 0, 0], sizes = [2, 1, 16, 64], strides = [1, 1, 1, 1]} : vector<2x8x16x64xf32> to vector<2x1x16x64xf32>
    %134 = vector.shape_cast %133 : vector<2x1x16x64xf32> to vector<2x16x64xf32>
    %135 = arith.addf %132, %134 : vector<2x16x64xf32>
    %136 = vector.extract_strided_slice %93 {offsets = [0, 2, 0, 0], sizes = [2, 1, 16, 64], strides = [1, 1, 1, 1]} : vector<2x8x16x64xf32> to vector<2x1x16x64xf32>
    %137 = vector.shape_cast %136 : vector<2x1x16x64xf32> to vector<2x16x64xf32>
    %138 = arith.mulf %137, %129 : vector<2x16x64xf32>
    %139 = vector.extract_strided_slice %102 {offsets = [0, 2, 0, 0], sizes = [2, 1, 16, 64], strides = [1, 1, 1, 1]} : vector<2x8x16x64xf32> to vector<2x1x16x64xf32>
    %140 = vector.shape_cast %139 : vector<2x1x16x64xf32> to vector<2x16x64xf32>
    %141 = arith.addf %138, %140 : vector<2x16x64xf32>
    %142 = vector.extract_strided_slice %94 {offsets = [0, 5, 0, 0], sizes = [2, 1, 16, 64], strides = [1, 1, 1, 1]} : vector<2x8x16x64xf32> to vector<2x1x16x64xf32>
    %143 = vector.shape_cast %142 : vector<2x1x16x64xf32> to vector<2x16x64xf32>
    %144 = arith.mulf %143, %135 : vector<2x16x64xf32>
    %145 = vector.extract_strided_slice %109 {offsets = [0, 5, 0, 0], sizes = [2, 1, 16, 64], strides = [1, 1, 1, 1]} : vector<2x8x16x64xf32> to vector<2x1x16x64xf32>
    %146 = vector.shape_cast %145 : vector<2x1x16x64xf32> to vector<2x16x64xf32>
    %147 = arith.addf %144, %146 : vector<2x16x64xf32>
    %148 = vector.extract_strided_slice %93 {offsets = [0, 3, 0, 0], sizes = [2, 1, 16, 64], strides = [1, 1, 1, 1]} : vector<2x8x16x64xf32> to vector<2x1x16x64xf32>
    %149 = vector.shape_cast %148 : vector<2x1x16x64xf32> to vector<2x16x64xf32>
    %150 = arith.mulf %149, %141 : vector<2x16x64xf32>
    %151 = vector.extract_strided_slice %102 {offsets = [0, 3, 0, 0], sizes = [2, 1, 16, 64], strides = [1, 1, 1, 1]} : vector<2x8x16x64xf32> to vector<2x1x16x64xf32>
    %152 = vector.shape_cast %151 : vector<2x1x16x64xf32> to vector<2x16x64xf32>
    %153 = arith.addf %150, %152 : vector<2x16x64xf32>
    %154 = vector.extract_strided_slice %94 {offsets = [0, 4, 0, 0], sizes = [2, 1, 16, 64], strides = [1, 1, 1, 1]} : vector<2x8x16x64xf32> to vector<2x1x16x64xf32>
    %155 = vector.shape_cast %154 : vector<2x1x16x64xf32> to vector<2x16x64xf32>
    %156 = arith.mulf %155, %147 : vector<2x16x64xf32>
    %157 = vector.extract_strided_slice %109 {offsets = [0, 4, 0, 0], sizes = [2, 1, 16, 64], strides = [1, 1, 1, 1]} : vector<2x8x16x64xf32> to vector<2x1x16x64xf32>
    %158 = vector.shape_cast %157 : vector<2x1x16x64xf32> to vector<2x16x64xf32>
    %159 = arith.addf %156, %158 : vector<2x16x64xf32>
    %160 = vector.extract_strided_slice %93 {offsets = [0, 4, 0, 0], sizes = [2, 1, 16, 64], strides = [1, 1, 1, 1]} : vector<2x8x16x64xf32> to vector<2x1x16x64xf32>
    %161 = vector.shape_cast %160 : vector<2x1x16x64xf32> to vector<2x16x64xf32>
    %162 = arith.mulf %161, %153 : vector<2x16x64xf32>
    %163 = vector.extract_strided_slice %102 {offsets = [0, 4, 0, 0], sizes = [2, 1, 16, 64], strides = [1, 1, 1, 1]} : vector<2x8x16x64xf32> to vector<2x1x16x64xf32>
    %164 = vector.shape_cast %163 : vector<2x1x16x64xf32> to vector<2x16x64xf32>
    %165 = arith.addf %162, %164 : vector<2x16x64xf32>
    %166 = vector.extract_strided_slice %94 {offsets = [0, 3, 0, 0], sizes = [2, 1, 16, 64], strides = [1, 1, 1, 1]} : vector<2x8x16x64xf32> to vector<2x1x16x64xf32>
    %167 = vector.shape_cast %166 : vector<2x1x16x64xf32> to vector<2x16x64xf32>
    %168 = arith.mulf %167, %159 : vector<2x16x64xf32>
    %169 = vector.extract_strided_slice %109 {offsets = [0, 3, 0, 0], sizes = [2, 1, 16, 64], strides = [1, 1, 1, 1]} : vector<2x8x16x64xf32> to vector<2x1x16x64xf32>
    %170 = vector.shape_cast %169 : vector<2x1x16x64xf32> to vector<2x16x64xf32>
    %171 = arith.addf %168, %170 : vector<2x16x64xf32>
    %172 = vector.extract_strided_slice %93 {offsets = [0, 5, 0, 0], sizes = [2, 1, 16, 64], strides = [1, 1, 1, 1]} : vector<2x8x16x64xf32> to vector<2x1x16x64xf32>
    %173 = vector.shape_cast %172 : vector<2x1x16x64xf32> to vector<2x16x64xf32>
    %174 = arith.mulf %173, %165 : vector<2x16x64xf32>
    %175 = vector.extract_strided_slice %102 {offsets = [0, 5, 0, 0], sizes = [2, 1, 16, 64], strides = [1, 1, 1, 1]} : vector<2x8x16x64xf32> to vector<2x1x16x64xf32>
    %176 = vector.shape_cast %175 : vector<2x1x16x64xf32> to vector<2x16x64xf32>
    %177 = arith.addf %174, %176 : vector<2x16x64xf32>
    %178 = vector.extract_strided_slice %94 {offsets = [0, 2, 0, 0], sizes = [2, 1, 16, 64], strides = [1, 1, 1, 1]} : vector<2x8x16x64xf32> to vector<2x1x16x64xf32>
    %179 = vector.shape_cast %178 : vector<2x1x16x64xf32> to vector<2x16x64xf32>
    %180 = arith.mulf %179, %171 : vector<2x16x64xf32>
    %181 = vector.extract_strided_slice %109 {offsets = [0, 2, 0, 0], sizes = [2, 1, 16, 64], strides = [1, 1, 1, 1]} : vector<2x8x16x64xf32> to vector<2x1x16x64xf32>
    %182 = vector.shape_cast %181 : vector<2x1x16x64xf32> to vector<2x16x64xf32>
    %183 = arith.addf %180, %182 : vector<2x16x64xf32>
    %184 = vector.extract_strided_slice %93 {offsets = [0, 6, 0, 0], sizes = [2, 1, 16, 64], strides = [1, 1, 1, 1]} : vector<2x8x16x64xf32> to vector<2x1x16x64xf32>
    %185 = vector.shape_cast %184 : vector<2x1x16x64xf32> to vector<2x16x64xf32>
    %186 = arith.mulf %185, %177 : vector<2x16x64xf32>
    %187 = vector.extract_strided_slice %102 {offsets = [0, 6, 0, 0], sizes = [2, 1, 16, 64], strides = [1, 1, 1, 1]} : vector<2x8x16x64xf32> to vector<2x1x16x64xf32>
    %188 = vector.shape_cast %187 : vector<2x1x16x64xf32> to vector<2x16x64xf32>
    %189 = arith.addf %186, %188 : vector<2x16x64xf32>
    %190 = vector.extract_strided_slice %94 {offsets = [0, 1, 0, 0], sizes = [2, 1, 16, 64], strides = [1, 1, 1, 1]} : vector<2x8x16x64xf32> to vector<2x1x16x64xf32>
    %191 = vector.shape_cast %190 : vector<2x1x16x64xf32> to vector<2x16x64xf32>
    %192 = arith.mulf %191, %183 : vector<2x16x64xf32>
    %193 = vector.extract_strided_slice %109 {offsets = [0, 1, 0, 0], sizes = [2, 1, 16, 64], strides = [1, 1, 1, 1]} : vector<2x8x16x64xf32> to vector<2x1x16x64xf32>
    %194 = vector.shape_cast %193 : vector<2x1x16x64xf32> to vector<2x16x64xf32>
    %195 = arith.addf %192, %194 : vector<2x16x64xf32>
    %196 = vector.extract_strided_slice %93 {offsets = [0, 7, 0, 0], sizes = [2, 1, 16, 64], strides = [1, 1, 1, 1]} : vector<2x8x16x64xf32> to vector<2x1x16x64xf32>
    %197 = vector.shape_cast %196 : vector<2x1x16x64xf32> to vector<2x16x64xf32>
    %198 = arith.mulf %197, %189 : vector<2x16x64xf32>
    %199 = vector.extract_strided_slice %102 {offsets = [0, 7, 0, 0], sizes = [2, 1, 16, 64], strides = [1, 1, 1, 1]} : vector<2x8x16x64xf32> to vector<2x1x16x64xf32>
    %200 = vector.shape_cast %199 : vector<2x1x16x64xf32> to vector<2x16x64xf32>
    %201 = arith.addf %198, %200 : vector<2x16x64xf32>
    %202 = vector.extract_strided_slice %94 {offsets = [0, 0, 0, 0], sizes = [2, 1, 16, 64], strides = [1, 1, 1, 1]} : vector<2x8x16x64xf32> to vector<2x1x16x64xf32>
    %203 = vector.shape_cast %202 : vector<2x1x16x64xf32> to vector<2x16x64xf32>
    %204 = arith.mulf %203, %195 : vector<2x16x64xf32>
    %205 = vector.extract_strided_slice %109 {offsets = [0, 0, 0, 0], sizes = [2, 1, 16, 64], strides = [1, 1, 1, 1]} : vector<2x8x16x64xf32> to vector<2x1x16x64xf32>
    %206 = vector.shape_cast %205 : vector<2x1x16x64xf32> to vector<2x16x64xf32>
    %207 = arith.addf %204, %206 : vector<2x16x64xf32>
    %208 = vector.shape_cast %117 : vector<2x16x64xf32> to vector<2x1x16x64xf32>
    %209 = vector.shape_cast %129 : vector<2x16x64xf32> to vector<2x1x16x64xf32>
    %210 = vector.shape_cast %141 : vector<2x16x64xf32> to vector<2x1x16x64xf32>
    %211 = vector.shape_cast %153 : vector<2x16x64xf32> to vector<2x1x16x64xf32>
    %212 = vector.shape_cast %165 : vector<2x16x64xf32> to vector<2x1x16x64xf32>
    %213 = vector.shape_cast %177 : vector<2x16x64xf32> to vector<2x1x16x64xf32>
    %214 = vector.shape_cast %189 : vector<2x16x64xf32> to vector<2x1x16x64xf32>
    %215 = vector.shape_cast %201 : vector<2x16x64xf32> to vector<2x1x16x64xf32>
    %216 = tpu.concatenate %208, %209, %210, %211, %212, %213, %214, %215 in 1 : vector<2x1x16x64xf32>, vector<2x1x16x64xf32>, vector<2x1x16x64xf32>, vector<2x1x16x64xf32>, vector<2x1x16x64xf32>, vector<2x1x16x64xf32>, vector<2x1x16x64xf32>, vector<2x1x16x64xf32> -> vector<2x8x16x64xf32>
    %217 = vector.shape_cast %216 : vector<2x8x16x64xf32> to vector<2x128x64xf32>
    %218 = vector.shape_cast %207 : vector<2x16x64xf32> to vector<2x1x16x64xf32>
    %219 = vector.shape_cast %195 : vector<2x16x64xf32> to vector<2x1x16x64xf32>
    %220 = vector.shape_cast %183 : vector<2x16x64xf32> to vector<2x1x16x64xf32>
    %221 = vector.shape_cast %171 : vector<2x16x64xf32> to vector<2x1x16x64xf32>
    %222 = vector.shape_cast %159 : vector<2x16x64xf32> to vector<2x1x16x64xf32>
    %223 = vector.shape_cast %147 : vector<2x16x64xf32> to vector<2x1x16x64xf32>
    %224 = vector.shape_cast %135 : vector<2x16x64xf32> to vector<2x1x16x64xf32>
    %225 = vector.shape_cast %123 : vector<2x16x64xf32> to vector<2x1x16x64xf32>
    %226 = tpu.concatenate %218, %219, %220, %221, %222, %223, %224, %225 in 1 : vector<2x1x16x64xf32>, vector<2x1x16x64xf32>, vector<2x1x16x64xf32>, vector<2x1x16x64xf32>, vector<2x1x16x64xf32>, vector<2x1x16x64xf32>, vector<2x1x16x64xf32>, vector<2x1x16x64xf32> -> vector<2x8x16x64xf32>
    %227 = vector.shape_cast %226 : vector<2x8x16x64xf32> to vector<2x128x64xf32>
    %228 = vector.shape_cast %80 : vector<16x128xf32> to vector<2x8x128xf32>
    %229 = vector.shape_cast %86 : vector<8x128xf32> to vector<1x8x128xf32>
    %230 = vector.broadcast %229 : vector<1x8x128xf32> to vector<2x8x128xf32>
    %231 = arith.mulf %228, %230 : vector<2x8x128xf32>
    %232 = vector.shape_cast %81 : vector<16x128xf32> to vector<2x8x128xf32>
    %233 = vector.shape_cast %86 : vector<8x128xf32> to vector<1x8x128xf32>
    %234 = vector.broadcast %233 : vector<1x8x128xf32> to vector<2x8x128xf32>
    %235 = arith.mulf %232, %234 : vector<2x8x128xf32>
    %236 = vector.extract_strided_slice %231 {offsets = [0, 0, 0], sizes = [1, 8, 128], strides = [1, 1, 1]} : vector<2x8x128xf32> to vector<1x8x128xf32>
    %237 = vector.shape_cast %236 : vector<1x8x128xf32> to vector<8x128xf32>
    %238 = vector.extract_strided_slice %217 {offsets = [0, 0, 0], sizes = [1, 128, 64], strides = [1, 1, 1]} : vector<2x128x64xf32> to vector<1x128x64xf32>
    %239 = vector.shape_cast %238 : vector<1x128x64xf32> to vector<128x64xf32>
    %cst_29 = arith.constant dense<0.000000e+00> : vector<8x64xf32>
    %240 = tpu.matmul %237, %239, %cst_29 {dimension_numbers = #tpu.dot_dimension_numbers<[1], [0], [0], [1], [0, 0, 1, 1], [], []>} : vector<8x128xf32>, vector<128x64xf32>, vector<8x64xf32> -> vector<8x64xf32>
    %241 = vector.extract_strided_slice %235 {offsets = [0, 0, 0], sizes = [1, 8, 128], strides = [1, 1, 1]} : vector<2x8x128xf32> to vector<1x8x128xf32>
    %242 = vector.shape_cast %241 : vector<1x8x128xf32> to vector<8x128xf32>
    %243 = vector.extract_strided_slice %227 {offsets = [0, 0, 0], sizes = [1, 128, 64], strides = [1, 1, 1]} : vector<2x128x64xf32> to vector<1x128x64xf32>
    %244 = vector.shape_cast %243 : vector<1x128x64xf32> to vector<128x64xf32>
    %cst_30 = arith.constant dense<0.000000e+00> : vector<8x64xf32>
    %245 = tpu.matmul %242, %244, %cst_30 {dimension_numbers = #tpu.dot_dimension_numbers<[1], [0], [0], [1], [0, 0, 1, 1], [], []>} : vector<8x128xf32>, vector<128x64xf32>, vector<8x64xf32> -> vector<8x64xf32>
    %246 = tpu.concatenate %240, %245 in 1 : vector<8x64xf32>, vector<8x64xf32> -> vector<8x128xf32>
    %247 = vector.extract_strided_slice %231 {offsets = [1, 0, 0], sizes = [1, 8, 128], strides = [1, 1, 1]} : vector<2x8x128xf32> to vector<1x8x128xf32>
    %248 = vector.shape_cast %247 : vector<1x8x128xf32> to vector<8x128xf32>
    %249 = vector.extract_strided_slice %217 {offsets = [1, 0, 0], sizes = [1, 128, 64], strides = [1, 1, 1]} : vector<2x128x64xf32> to vector<1x128x64xf32>
    %250 = vector.shape_cast %249 : vector<1x128x64xf32> to vector<128x64xf32>
    %cst_31 = arith.constant dense<0.000000e+00> : vector<8x64xf32>
    %251 = tpu.matmul %248, %250, %cst_31 {dimension_numbers = #tpu.dot_dimension_numbers<[1], [0], [0], [1], [0, 0, 1, 1], [], []>} : vector<8x128xf32>, vector<128x64xf32>, vector<8x64xf32> -> vector<8x64xf32>
    %252 = vector.extract_strided_slice %235 {offsets = [1, 0, 0], sizes = [1, 8, 128], strides = [1, 1, 1]} : vector<2x8x128xf32> to vector<1x8x128xf32>
    %253 = vector.shape_cast %252 : vector<1x8x128xf32> to vector<8x128xf32>
    %254 = vector.extract_strided_slice %227 {offsets = [1, 0, 0], sizes = [1, 128, 64], strides = [1, 1, 1]} : vector<2x128x64xf32> to vector<1x128x64xf32>
    %255 = vector.shape_cast %254 : vector<1x128x64xf32> to vector<128x64xf32>
    %cst_32 = arith.constant dense<0.000000e+00> : vector<8x64xf32>
    %256 = tpu.matmul %253, %255, %cst_32 {dimension_numbers = #tpu.dot_dimension_numbers<[1], [0], [0], [1], [0, 0, 1, 1], [], []>} : vector<8x128xf32>, vector<128x64xf32>, vector<8x64xf32> -> vector<8x64xf32>
    %257 = tpu.concatenate %251, %256 in 1 : vector<8x64xf32>, vector<8x64xf32> -> vector<8x128xf32>
    %258 = tpu.concatenate %246, %257 in 0 : vector<8x128xf32>, vector<8x128xf32> -> vector<16x128xf32>
    %259 = vector.broadcast %85 : vector<1x128xf32> to vector<16x128xf32>
    %260 = arith.mulf %66, %259 : vector<16x128xf32>
    %261 = arith.addf %258, %260 : vector<16x128xf32>
    %262 = vector.extract_strided_slice %261 {offsets = [0, 0], sizes = [16, 64], strides = [1, 1]} : vector<16x128xf32> to vector<16x64xf32>
    %263 = vector.extract_strided_slice %261 {offsets = [0, 64], sizes = [16, 64], strides = [1, 1]} : vector<16x128xf32> to vector<16x64xf32>
    %264 = arith.addf %262, %263 : vector<16x64xf32>
    %cst_33 = arith.constant 0.000000e+00 : f32
    %265 = vector.broadcast %cst_33 : f32 to vector<16x64xf32>
    %266 = arith.subf %265, %7 : vector<16x64xf32>
    %267 = math.exp %266 : vector<16x64xf32>
    %cst_34 = arith.constant 1.000000e+00 : f32
    %268 = vector.broadcast %cst_34 : f32 to vector<16x64xf32>
    %269 = arith.addf %268, %267 : vector<16x64xf32>
    %cst_35 = arith.constant 1.000000e+00 : f32
    %270 = vector.broadcast %cst_35 : f32 to vector<16x64xf32>
    %271 = arith.divf %270, %269 : vector<16x64xf32>
    %272 = arith.mulf %7, %271 : vector<16x64xf32>
    %273 = arith.mulf %264, %272 : vector<16x64xf32>
    %c0_36 = arith.constant 0 : index
    %c0_37 = arith.constant 0 : index
    %274 = vector.load %arg5[%c0_36, %c0_37] : memref<65x32xf32, #tpu.memory_space<vmem>>, vector<64x32xf32>
    %c64 = arith.constant 64 : index
    %c0_38 = arith.constant 0 : index
    %275 = vector.load %arg5[%c64, %c0_38] : memref<65x32xf32, #tpu.memory_space<vmem>>, vector<1x32xf32>
    %cst_39 = arith.constant dense<0.000000e+00> : vector<16x32xf32>
    %276 = tpu.matmul %273, %274, %cst_39 {dimension_numbers = #tpu.dot_dimension_numbers<[1], [0], [0], [1], [0, 0, 1, 1], [], []>} : vector<16x64xf32>, vector<64x32xf32>, vector<16x32xf32> -> vector<16x32xf32>
    %277 = vector.broadcast %275 : vector<1x32xf32> to vector<16x32xf32>
    %278 = arith.addf %276, %277 : vector<16x32xf32>
    %c0_40 = arith.constant 0 : index
    %c0_41 = arith.constant 0 : index
    %279 = vector.load %arg6[%c0_40, %c0_41] : memref<16x32xf32, #tpu.memory_space<vmem>>, vector<16x32xf32>
    tpu.vector_store %arg6[%c0_40, %c0_41], %278 {strides = array<i32>} : memref<16x32xf32, #tpu.memory_space<vmem>>, vector<16x32xf32>,
    return
  }
}

</mosaic_0001>

<bundles_post_ra>
// kernel: modified_mamba_forward.1
= control target key start
LH: loop header
LB: loop body
LE: loop exit
PB: predicated region body
PF: predicated region fallthrough
CT: control target
= control target key end

     0   :  { %vm35_vm0 = vcmask 261120   ;;  %s3886_s0 = inlined_call_operand.vmem [shape: f32[16,32], index: 0, kind: input, shape index: {}]   ;;  %s3887_s1 = inlined_call_operand.vmem [shape: f32[33,128], index: 1, kind: input, shape index: {}]   ;;  %s3888_s2 = inlined_call_operand.vmem [shape: f32[8,128], index: 2, kind: input, shape index: {}]   ;;  %s3889_s3 = inlined_call_operand.vmem [shape: f32[129,416], index: 3, kind: input, shape index: {}]   ;;  %s3890_s4 = inlined_call_operand.vmem [shape: f32[25,128], index: 4, kind: input, shape index: {}]   ;;  %s3891_s5 = inlined_call_operand.vmem [shape: f32[65,32], index: 5, kind: input, shape index: {}]   ;;  %s3892_s6 = inlined_call_operand.hbm [shape: f32[16,32], index: 6, kind: output, shape index: {}]  }
   0x1   :  { %v26_v0 = vld [vmem:[%s3887_s1] sm:$0xff]  ;;  %v27_v1 = vld [vmem:[%s3887_s1 + $0x8] sm:$0xff]  ;;  %v28_v2 = vld [vmem:[%s3887_s1 + $0x10] sm:$0xff] }
   0x2   :  { %v2383_v3 = vpack.c.bf16 %v27_v1, %v26_v0  ;;  %v29_v4 = vld [vmem:[%s3887_s1 + $0x18] sm:$0xff]  ;;  %v24_v5 = vld [vmem:[%s3886_s0] sm:$0xff] }
   0x3   :  { %v2387_v6 = vpack.c.bf16 %v29_v4, %v28_v2  ;;  %2221 = vmatprep.mubr.msk.f32.mxu0 %vm35_vm0, %v24_v5 }
   0x4   :  { %11 = vsyncpa [#allocation3], 0  ;;  %2384 = vmatprep.subr.bf16.mxu0 %v2383_v3  ;;  %v25_v7 = vld [vmem:[%s3886_s0 + $0x8] sm:$0xff]  ;;  %v2113_v8 = vld [vmem:[%s3887_s1 + $0x20] ss:$0 sm:$0xff]  ;;  %s2769_s11 = smov 64  }
   0x5   :  { %2386 = vmatpush3.bf16.msra.mxu0 %v2383_v3  ;;  %v311_v13 = vld [vmem:[%s3889_s3 + $0x8] sm:$0xff]  ;;  %v313_v15 = vld [vmem:[%s3889_s3 + $0x18] sm:$0xff]  ;;  %v310_v18 = vld [vmem:[%s3889_s3] sm:$0xff]  ;;  %v3893_v20 = vmov 0.0   ;;  %vm125_vm1 = vcmask 523264   ;;  %vm134_vm2 = vcmask 1042432  }
   0x6   :  { %2388 = vmatprep.subr.bf16.mxu0 %v2387_v6  ;;  %v315_v14 = vld [vmem:[%s3889_s3 + $0x28] sm:$0xff]  ;;  %v317_v17 = vld [vmem:[%s3889_s3 + $0x38] sm:$0xff]  ;;  %v314_v19 = vld [vmem:[%s3889_s3 + $0x20] sm:$0xff]  ;;  %461 = vmatprep.mubr.f32.mxu1 %v3893_v20  ;;  %vm166_vm3 = vcmask 1046528   ;;  %vm190_vm4 = vcmask 1045504   ;;  %vm214_vm5 = vcmask 1044480  }
   0x7   :  { %v2391_v16 = vpack.c.bf16 %v315_v14, %v311_v13  ;;  %v2423_v21 = vpack.c.bf16 %v317_v17, %v313_v15  ;;  %v2393_v22 = vpack.c.bf16 %v314_v19, %v310_v18  ;;  %v312_v23 = vld [vmem:[%s3889_s3 + $0x10] sm:$0xff]  ;;  %v319_v25 = vld [vmem:[%s3889_s3 + $0x48] sm:$0xff]  ;;  %v321_v28 = vld [vmem:[%s3889_s3 + $0x58] sm:$0xff]  ;;  %vm238_vm6 = vcmask 1043456   ;;  %s2774_s8 = smov [#allocation2]  }
   0x8   :  { %v316_v24 = vld [vmem:[%s3889_s3 + $0x30] sm:$0xff]  ;;  %v323_v27 = vld [vmem:[%s3889_s3 + $0x68] sm:$0xff]  ;;  %v325_v29 = vld [vmem:[%s3889_s3 + $0x78] sm:$0xff]  ;;  %vm285_vm7 = vcmask 1041408   ;;  %vm2773_vm12 = vmmov 0   ;;  %s2102_s9 = sshll.u32 %s2774_s8, 4  ;;  %s2103_s9 = int_to_ptr.vmem [resolvable:$true] %s2102_s9 }
   0x9   :  { %2390 = vmatpush3.bf16.msra.mxu0 %v2387_v6  ;;  %2392 = vmatprep.subr.bf16.mxu1 %v2391_v16  ;;  %v2425_v26 = vpack.c.bf16 %v316_v24, %v312_v23  ;;  %v2395_v30 = vpack.c.bf16 %v323_v27, %v319_v25  ;;  %v2427_v31 = vpack.c.bf16 %v325_v29, %v321_v28  ;;  %v318_v32 = vld [vmem:[%s3889_s3 + $0x40] sm:$0xff]  ;;  %v320_v34 = vld [vmem:[%s3889_s3 + $0x50] sm:$0xff]  ;;  %v327_v37 = vld [vmem:[%s3889_s3 + $0x88] sm:$0xff]  ;;  %p2750_p1 = scmp.lt.s32.totalorder %s2103_s9, %s2103_s9 }
   0xa   :  { %2424 = vmatprep.subr.bf16.mxu0 %v2423_v21  ;;  %2394 = vmatpush1.bf16.msra.mxu1 %v2393_v22  ;;  %v322_v33 = vld [vmem:[%s3889_s3 + $0x60] sm:$0xff]  ;;  %v324_v36 = vld [vmem:[%s3889_s3 + $0x70] sm:$0xff]  ;;  %v331_v38 = vld [vmem:[%s3889_s3 + $0xa8] sm:$0xff] }
   0xb   :  { %v2397_v35 = vpack.c.bf16 %v322_v33, %v318_v32  ;;  %2396 = vmatprep.subr.bf16.mxu1 %v2395_v30  ;;  %v2429_v39 = vpack.c.bf16 %v324_v36, %v320_v34  ;;  %v2399_v40 = vpack.c.bf16 %v331_v38, %v327_v37  ;;  %v329_v41 = vld [vmem:[%s3889_s3 + $0x98] sm:$0xff]  ;;  %v326_v43 = vld [vmem:[%s3889_s3 + $0x80] sm:$0xff]  ;;  %v328_v46 = vld [vmem:[%s3889_s3 + $0x90] sm:$0xff] }
   0xc   :  { %2222 = vmatmul.mubr.msk.f32.vlgmr.msra.gmra.mrb[0].mxu0 %vm35_vm0, %v25_v7  ;;  %v333_v42 = vld [vmem:[%s3889_s3 + $0xb8] sm:$0xff]  ;;  %v330_v45 = vld [vmem:[%s3889_s3 + $0xa0] sm:$0xff]  ;;  %v332_v47 = vld [vmem:[%s3889_s3 + $0xb0] sm:$0xff] }
   0xd   :  { %538 = vmatprep.mubr.f32.mxu0 %v3893_v20  ;;  %2426 = vmatpush1.bf16.msra.mxu0 %v2425_v26  ;;  %v2431_v44 = vpack.c.bf16 %v333_v42, %v329_v41  ;;  %v2401_v48 = vpack.c.bf16 %v330_v45, %v326_v43  ;;  %v335_v49 = vld [vmem:[%s3889_s3 + $0xc8] sm:$0xff]  ;;  %v337_v51 = vld [vmem:[%s3889_s3 + $0xd8] sm:$0xff]  ;;  %v2433_v52 = vpack.c.bf16 %v332_v47, %v328_v46  ;;  %v334_v55 = vld [vmem:[%s3889_s3 + $0xc0] sm:$0xff] }
   0xe   :  { %2428 = vmatprep.subr.bf16.mxu0 %v2427_v31  ;;  %2398 = vmatpush1.bf16.msra.mxu1 %v2397_v35  ;;  %v339_v50 = vld [vmem:[%s3889_s3 + $0xe8] sm:$0xff]  ;;  %v341_v54 = vld [vmem:[%s3889_s3 + $0xf8] sm:$0xff]  ;;  %v338_v56 = vld [vmem:[%s3889_s3 + $0xe0] sm:$0xff] }
   0xf   :  { %2400 = vmatprep.subr.bf16.mxu1 %v2399_v40  ;;  %v2403_v53 = vpack.c.bf16 %v339_v50, %v335_v49  ;;  %v2435_v57 = vpack.c.bf16 %v341_v54, %v337_v51  ;;  %v336_v58 = vld [vmem:[%s3889_s3 + $0xd0] sm:$0xff]  ;;  %v343_v60 = vld [vmem:[%s3889_s3 + $0x108] sm:$0xff]  ;;  %v345_v62 = vld [vmem:[%s3889_s3 + $0x118] sm:$0xff]  ;;  %v2405_v0 = vpack.c.bf16 %v338_v56, %v334_v55 }
  0x10   :  { %v340_v59 = vld [vmem:[%s3889_s3 + $0xf0] sm:$0xff]  ;;  %v347_v61 = vld [vmem:[%s3889_s3 + $0x128] sm:$0xff]  ;;  %v349_v63 = vld [vmem:[%s3889_s3 + $0x138] sm:$0xff] }
  0x11   :  { %2430 = vmatpush1.bf16.msra.mxu0 %v2429_v39  ;;  %v2437_v1 = vpack.c.bf16 %v340_v59, %v336_v58  ;;  %v2407_v2 = vpack.c.bf16 %v347_v61, %v343_v60  ;;  %v342_v3 = vld [vmem:[%s3889_s3 + $0x100] sm:$0xff]  ;;  %v344_v5 = vld [vmem:[%s3889_s3 + $0x110] sm:$0xff]  ;;  %v2439_v6 = vpack.c.bf16 %v349_v63, %v345_v62  ;;  %v357_v13 = vld [vmem:[%s3889_s3 + $0x178] sm:$0xff] }
  0x12   :  { %2432 = vmatprep.subr.bf16.mxu0 %v2431_v44  ;;  %2402 = vmatpush1.bf16.msra.mxu1 %v2401_v48  ;;  %v346_v4 = vld [vmem:[%s3889_s3 + $0x120] sm:$0xff]  ;;  %v348_v7 = vld [vmem:[%s3889_s3 + $0x130] sm:$0xff]  ;;  %v359_v23 = vld [vmem:[%s3889_s3 + $0x188] sm:$0xff] }
  0x13   :  { %2404 = vmatprep.subr.bf16.mxu1 %v2403_v53  ;;  %v2409_v14 = vpack.c.bf16 %v346_v4, %v342_v3  ;;  %v2441_v15 = vpack.c.bf16 %v348_v7, %v344_v5  ;;  %v350_v17 = vld [vmem:[%s3889_s3 + $0x140] sm:$0xff]  ;;  %v352_v19 = vld [vmem:[%s3889_s3 + $0x150] sm:$0xff]  ;;  %v363_v24 = vld [vmem:[%s3889_s3 + $0x1a8] sm:$0xff] }
  0x14   :  { %v354_v18 = vld [vmem:[%s3889_s3 + $0x160] sm:$0xff]  ;;  %v356_v22 = vld [vmem:[%s3889_s3 + $0x170] sm:$0xff]  ;;  %v361_v25 = vld [vmem:[%s3889_s3 + $0x198] sm:$0xff]  ;;  %v2415_v29 = vpack.c.bf16 %v363_v24, %v359_v23 }
  0x15   :  { %2434 = vmatpush1.bf16.msra.mxu0 %v2433_v52  ;;  %v365_v26 = vld [vmem:[%s3889_s3 + $0x1b8] sm:$0xff]  ;;  %v2413_v27 = vpack.c.bf16 %v354_v18, %v350_v17  ;;  %v2445_v28 = vpack.c.bf16 %v356_v22, %v352_v19  ;;  %v358_v30 = vld [vmem:[%s3889_s3 + $0x180] sm:$0xff]  ;;  %v360_v32 = vld [vmem:[%s3889_s3 + $0x190] sm:$0xff] }
  0x16   :  { %2436 = vmatprep.subr.bf16.mxu0 %v2435_v57  ;;  %2406 = vmatpush1.bf16.msra.mxu1 %v2405_v0  ;;  %v362_v31 = vld [vmem:[%s3889_s3 + $0x1a0] sm:$0xff]  ;;  %v2447_v33 = vpack.c.bf16 %v365_v26, %v361_v25  ;;  %v364_v34 = vld [vmem:[%s3889_s3 + $0x1b0] sm:$0xff]  ;;  %v367_v35 = vld [vmem:[%s3889_s3 + $0x1c8] sm:$0xff] }
  0x17   :  { %2408 = vmatprep.subr.bf16.mxu1 %v2407_v2  ;;  %v371_v36 = vld [vmem:[%s3889_s3 + $0x1e8] sm:$0xff]  ;;  %v369_v37 = vld [vmem:[%s3889_s3 + $0x1d8] sm:$0xff]  ;;  %v2417_v39 = vpack.c.bf16 %v362_v31, %v358_v30  ;;  %v2449_v40 = vpack.c.bf16 %v364_v34, %v360_v32  ;;  %v366_v42 = vld [vmem:[%s3889_s3 + $0x1c0] sm:$0xff] }
  0x18   :  { %v373_v38 = vld [vmem:[%s3889_s3 + $0x1f8] sm:$0xff]  ;;  %v2419_v41 = vpack.c.bf16 %v371_v36, %v367_v35  ;;  %v370_v43 = vld [vmem:[%s3889_s3 + $0x1e0] sm:$0xff]  ;;  %v368_v45 = vld [vmem:[%s3889_s3 + $0x1d0] sm:$0xff] }
  0x19   :  { %2438 = vmatpush1.bf16.msra.mxu0 %v2437_v1  ;;  %v2451_v44 = vpack.c.bf16 %v373_v38, %v369_v37  ;;  %v372_v46 = vld [vmem:[%s3889_s3 + $0x1f0] sm:$0xff]  ;;  %v2421_v47 = vpack.c.bf16 %v370_v43, %v366_v42  ;;  %v2117_v50 = vld [vmem:[%s3888_s2] ss:$0 sm:$0xff]  ;;  %v2118_v52 = vld [vmem:[%s3888_s2 + $0x1] ss:$0 sm:$0xff] }
  0x1a   :  { %2440 = vmatprep.subr.bf16.mxu0 %v2439_v6  ;;  %2410 = vmatpush1.bf16.msra.mxu1 %v2409_v14  ;;  %v2453_v48 = vpack.c.bf16 %v372_v46, %v368_v45  ;;  %v2119_v53 = vld [vmem:[%s3888_s2 + $0x2] ss:$0 sm:$0xff]  ;;  %v2120_v55 = vld [vmem:[%s3888_s2 + $0x3] ss:$0 sm:$0xff]  ;;  %v2116_v56 = vld [vmem:[%s3888_s2 + $0x7] ss:$0 sm:$0xff] }
  0x1b   :  { %v2121_v59 = vld [vmem:[%s3888_s2 + $0x4] ss:$0 sm:$0xff]  ;;  %v2122_v0 = vld [vmem:[%s3888_s2 + $0x5] ss:$0 sm:$0xff]  ;;  %v2123_v19 = vld [vmem:[%s3888_s2 + $0x6] ss:$0 sm:$0xff] }
  0x1d   :  { %2442 = vmatpush1.bf16.msra.mxu0 %v2441_v15 }
  0xdf   :  { %v2223_v9 = vpop.f32.mrb[0].mxu0 }
  0xe0   :  { %v108_v10 = vpop.f32.mrb[1].mxu0  ;;  %v2839_v12 = vadd.f32 %v2223_v9, %v2113_v8  ;;  %v355_v9 = vld [vmem:[%s3889_s3 + $0x168] sm:$0xff] }
  0xe1   :  { %v2835_v11 = vadd.f32 %v2113_v8, %v108_v10  ;;  %v351_v8 = vld [vmem:[%s3889_s3 + $0x148] sm:$0xff]  ;;  %v353_v10 = vld [vmem:[%s3889_s3 + $0x158] sm:$0xff] }
  0xe2   :  { %3945 = vst [vmem:[#allocation6_spill] sm:$0xff] %v2839_v12  ;;  %v2411_v16 = vpack.c.bf16 %v355_v9, %v351_v8  ;;  %v2443_v21 = vpack.c.bf16 %v357_v13, %v353_v10 }
  0xe3   :  { %3944 = vst [vmem:[#allocation5_spill] sm:$0xff] %v2835_v11  ;;  %119 = vrot.lane.b32.xlu0 %v2835_v11, %s2769_s11 }
  0xe4   :  { %2412 = vmatprep.subr.bf16.mxu1 %v2411_v16  ;;  %2444 = vmatprep.subr.bf16.mxu0 %v2443_v21 }
  0xe5   :  { %2414 = vmatpush1.bf16.msra.mxu1 %v2413_v27  ;;  %2446 = vmatpush1.bf16.msra.mxu0 %v2445_v28 }
  0xe6   :  { %2416 = vmatprep.subr.bf16.mxu1 %v2415_v29  ;;  %2448 = vmatprep.subr.bf16.mxu0 %v2447_v33 }
  0xe7   :  { %121 = vrot.lane.b32.xlu0 %v2839_v12, %s2769_s11 }
  0xe9   :  { %2418 = vmatpush1.bf16.msra.mxu1 %v2417_v39  ;;  %2450 = vmatpush1.bf16.msra.mxu0 %v2449_v40 }
  0xea   :  { %2420 = vmatprep.subr.bf16.mxu1 %v2419_v41  ;;  %2452 = vmatprep.subr.bf16.mxu0 %v2451_v44 }
  0xed   :  { %2422 = vmatpush1.bf16.msra.mxu1 %v2421_v47  ;;  %2454 = vmatpush1.bf16.msra.mxu0 %v2453_v48 }
 0x155   :  { %v120_v49 = vpop.permute.xlu0 %119 }
 0x156   :  { %v126_v51 = vsel %vm125_vm1, %v2835_v11, %v120_v49 }
 0x157   :  { %v130_v54 = vrot.slane %v126_v51, 5 }
 0x159   :  { %v135_v57 = vsel %vm134_vm2, 0.0, %v130_v54  ;;  %v137_v58 = vsel %vm134_vm2, %v130_v54, 0.0  ;;  %v122_v14 = vpop.permute.xlu0 %121 }
 0x15a   :  { %v149_v60 = vmul.f32 %v2117_v50, %v135_v57  ;;  %v158_v61 = vmul.f32 %v2118_v52, %v135_v57  ;;  %v159_v62 = vmul.f32 %v2118_v52, %v137_v58  ;;  %v182_v63 = vmul.f32 %v2119_v53, %v135_v57 }
 0x15b   :  { %v183_v1 = vmul.f32 %v2119_v53, %v137_v58  ;;  %v206_v2 = vmul.f32 %v2120_v55, %v135_v57  ;;  %v207_v3 = vmul.f32 %v2120_v55, %v137_v58  ;;  %v230_v10 = vmul.f32 %v2121_v59, %v135_v57 }
 0x15c   :  { %v151_v4 = vadd.f32 %v2116_v56, %v149_v60  ;;  %v167_v5 = vrot.slane %v158_v61, 1  ;;  %v168_v6 = vrot.slane %v159_v62, 1  ;;  %v191_v7 = vrot.slane %v182_v63, 2 }
 0x15d   :  { %v192_v8 = vrot.slane %v183_v1, 2  ;;  %v215_v9 = vrot.slane %v206_v2, 3  ;;  %v231_v13 = vmul.f32 %v2121_v59, %v137_v58  ;;  %v216_v16 = vrot.slane %v207_v3, 3 }
 0x15e   :  { %v169_v15 = vsel %vm166_vm3, %v167_v5, %v168_v6  ;;  %v254_v17 = vmul.f32 %v2122_v0, %v135_v57  ;;  %v255_v18 = vmul.f32 %v2122_v0, %v137_v58  ;;  %v127_v23 = vsel %vm125_vm1, %v2839_v12, %v122_v14 }
 0x15f   :  { %v175_v21 = vadd.f32 %v169_v15, %v151_v4  ;;  %v193_v22 = vsel %vm190_vm4, %v191_v7, %v192_v8  ;;  %v239_v24 = vrot.slane %v230_v10, 4  ;;  %v240_v25 = vrot.slane %v231_v13, 4 }
 0x160   :  { %v131_v26 = vrot.slane %v127_v23, 5  ;;  %v262_v28 = vrot.slane %v254_v17, 5  ;;  %v263_v29 = vrot.slane %v255_v18, 5  ;;  %v278_v30 = vmul.f32 %v2123_v19, %v137_v58 }
 0x161   :  { %v199_v27 = vadd.f32 %v193_v22, %v175_v21  ;;  %v217_v31 = vsel %vm214_vm5, %v215_v9, %v216_v16  ;;  %v277_v35 = vmul.f32 %v2123_v19, %v135_v57 }
 0x162   :  { %v136_v32 = vsel %vm134_vm2, 0.0, %v131_v26  ;;  %v138_v33 = vsel %vm134_vm2, %v131_v26, 0.0  ;;  %v287_v48 = vrot.slane %v278_v30, 6  ;;  %v264_v3 = vsel %vm134_vm2, %v262_v28, %v263_v29 }
 0x163   :  { %v223_v34 = vadd.f32 %v217_v31, %v199_v27  ;;  %v150_v36 = vmul.f32 %v2117_v50, %v136_v32  ;;  %v160_v37 = vmul.f32 %v2118_v52, %v136_v32  ;;  %v161_v38 = vmul.f32 %v2118_v52, %v138_v33 }
 0x164   :  { %v184_v39 = vmul.f32 %v2119_v53, %v136_v32  ;;  %v185_v40 = vmul.f32 %v2119_v53, %v138_v33  ;;  %v208_v41 = vmul.f32 %v2120_v55, %v136_v32  ;;  %v209_v42 = vmul.f32 %v2120_v55, %v138_v33 }
 0x165   :  { %v232_v43 = vmul.f32 %v2121_v59, %v136_v32  ;;  %v152_v44 = vadd.f32 %v2116_v56, %v150_v36  ;;  %v170_v45 = vrot.slane %v160_v37, 1  ;;  %v171_v46 = vrot.slane %v161_v38, 1  ;;  %v2124_v36 = vld [vmem:[%s3889_s3 + $0x200] ss:$8 sm:$0xf] }
 0x166   :  { %v194_v47 = vrot.slane %v184_v39, 2  ;;  %v195_v49 = vrot.slane %v185_v40, 2  ;;  %v218_v51 = vrot.slane %v208_v41, 3  ;;  %v233_v54 = vmul.f32 %v2121_v59, %v138_v33 }
 0x167   :  { %v172_v58 = vsel %vm166_vm3, %v170_v45, %v171_v46  ;;  %v219_v60 = vrot.slane %v209_v42, 3  ;;  %v256_v57 = vmul.f32 %v2122_v0, %v136_v32  ;;  %v257_v50 = vmul.f32 %v2122_v0, %v138_v33 }
 0x168   :  { %v176_v61 = vadd.f32 %v172_v58, %v152_v44  ;;  %v196_v52 = vsel %vm190_vm4, %v194_v47, %v195_v49  ;;  %v242_v53 = vrot.slane %v232_v43, 4  ;;  %v241_v55 = vsel %vm238_vm6, %v239_v24, %v240_v25 }
 0x169   :  { %v243_v62 = vrot.slane %v233_v54, 4  ;;  %v280_v56 = vmul.f32 %v2123_v19, %v138_v33  ;;  %v247_v63 = vadd.f32 %v241_v55, %v223_v34  ;;  %v286_v1 = vrot.slane %v277_v35, 6 }
 0x16a   :  { %v265_v2 = vrot.slane %v256_v57, 5  ;;  %v200_v4 = vadd.f32 %v196_v52, %v176_v61  ;;  %v266_v59 = vrot.slane %v257_v50, 5  ;;  %v220_v6 = vsel %vm214_vm5, %v218_v51, %v219_v60 }
 0x16b   :  { %v270_v5 = vadd.f32 %v264_v3, %v247_v63  ;;  %v279_v7 = vmul.f32 %v2123_v19, %v136_v32  ;;  %v288_v0 = vsel %vm285_vm7, %v286_v1, %v287_v48  ;;  %v290_v9 = vrot.slane %v280_v56, 6 }
 0x16c   :  { %v224_v8 = vadd.f32 %v220_v6, %v200_v4  ;;  %v244_v13 = vsel %vm238_vm6, %v242_v53, %v243_v62  ;;  %v267_v17 = vsel %vm134_vm2, %v265_v2, %v266_v59  ;;  %v377_v33 = vlaneseq  ;;  %v582_v53 = vld [vmem:[%s3890_s4 + $0x11] sm:$0xff] }
 0x16d   :  { %v294_v10 = vadd.f32 %v288_v0, %v270_v5  ;;  %v289_v14 = vrot.slane %v279_v7, 6 }
 0x16e   :  { %v248_v15 = vadd.f32 %v244_v13, %v224_v8  ;;  %v3091_v34 = vshrl.u32 %v377_v33, 7 }
 0x16f   :  { %v296_v16 = vsub.f32 0.0, %v294_v10  ;;  %v291_v22 = vsel %vm285_vm7, %v289_v14, %v290_v9 }
 0x170   :  { %v271_v18 = vadd.f32 %v267_v17, %v248_v15  ;;  %v3094_v35 = vsub.s32 3, %v3091_v34  ;;  %v3101_v38 = vsub.s32 0, %v3091_v34  ;;  %v1040_v41 = vsub.s32 7, %v3091_v34 }
 0x171   :  { %v298_v21 = vmul.f32 1.442695, %v296_v16  ;;  %v1029_v42 = vsub.s32 6, %v3091_v34  ;;  %v3108_v43 = vsub.s32 1, %v3091_v34  ;;  %v1018_v51 = vsub.s32 5, %v3091_v34 }
 0x172   :  { %v295_v23 = vadd.f32 %v291_v22, %v271_v18  ;;  %v392_v37 = vrot.slane %v2124_v36, %v3094_v35  ;;  %v380_v47 = vrot.slane %v2124_v36, %v3101_v38  ;;  %v1007_v56 = vsub.s32 4, %v3091_v34 }
 0x173   :  { %2655 = vpow2.f32 %v298_v21  ;;  %v3119_v54 = vrot.slane %v2124_v36, %v3108_v43  ;;  %v3147_v4 = vsub.s32 2, %v3091_v34  ;;  %v2771_v18 = vmov 1966171168  }
 0x174   :  { %v297_v24 = vsub.f32 0.0, %v295_v23  ;;  %v587_v21 = vunpack.c.l.s4 %v2771_v18 }
 0x175   :  { %3950 = vst [vmem:[#allocation11_spill] sm:$0xff] %v3119_v54  ;;  %3953 = vst [vmem:[#allocation14_spill] sm:$0xff] %v3147_v4 }
 0x176   :  { %v300_v19 = vmul.f32 1.442695, %v297_v24 }
 0x178   :  { %2657 = vpow2.f32 %v300_v19 }
 0x17d   :  { %v2656_v25 = vpop.eup %2655 }
 0x17e   :  { %v302_v26 = vadd.f32 1.0, %v2656_v25  ;;  %v588_v25 = vunpack.c.0.s8 %v587_v21 }
 0x180   :  { %2659 = vrcp.f32 %v302_v26 }
 0x182   :  { %v2658_v27 = vpop.eup %2657 }
 0x183   :  { %v303_v28 = vadd.f32 1.0, %v2658_v27 }
 0x185   :  { %2661 = vrcp.f32 %v303_v28 }
 0x18a   :  { %v2660_v29 = vpop.eup %2659 }
 0x18b   :  { %v3081_v30 = vmul.f32 %v2660_v29, %v294_v10 }
 0x18d   :  { %3946 = vst [vmem:[#allocation7_spill] sm:$0xff] %v3081_v30  ;;  %462 = vmatmul.mubr.f32.vlgmr.msra.gmra.mrb[0].mxu1 %v3081_v30  ;;  %539 = vmatmul.mubr.f32.vlgmr.msra.gmra.mrb[2].mxu0 %v3081_v30 }
 0x18e   :  { %467 = vmatprep.mubr.f32.mxu1 %v3893_v20  ;;  %544 = vmatprep.mubr.f32.mxu0 %v3893_v20 }
 0x18f   :  { %v2662_v31 = vpop.eup %2661 }
 0x190   :  { %v3087_v32 = vmul.f32 %v2662_v31, %v295_v23  ;;  %v3184_v31 = vsub.s32 %v588_v25, %v3091_v34 }
 0x192   :  { %3947 = vst [vmem:[#allocation8_spill] sm:$0xff] %v3087_v32  ;;  %468 = vmatmul.mubr.f32.gmra.mrb[2].mxu1 %v3087_v32  ;;  %545 = vmatmul.mubr.f32.gmra.mrb[4].mxu0 %v3087_v32 }
 0x260   :  { %v463_v39 = vpop.f32.mrb[0].mxu1  ;;  %v3103_v40 = vpop.f32.mrb[2].mxu0 }
 0x261   :  { %3948 = vst [vmem:[#allocation9_spill] sm:$0xff] %v3103_v40  ;;  %v3110_v44 = vpop.f32.mrb[1].mxu1  ;;  %v542_v45 = vpop.f32.mrb[3].mxu0  ;;  %v3156_v6 = vadd.f32 %v463_v39, %v380_v47 }
 0x262   :  { %3949 = vst [vmem:[#allocation10_spill] sm:$0xff] %v3110_v44  ;;  %v543_v46 = vadd.f32 %v542_v45, %v392_v37 }
 0x263   :  { %v553_v8 = vmin.f32 %v3156_v6, 20.0  ;;  %vm551_vm11 = vcmp.gt.f32.partialorder %v3156_v6, 20.0 }
 0x264   :  { %v3113_v48 = vrot.slane %v543_v46, %v1040_v41  ;;  %v3115_v49 = vrot.slane %v543_v46, %v1029_v42  ;;  %v3132_v62 = vrot.slane %v543_v46, %v1018_v51  ;;  %v3139_v2 = vrot.slane %v543_v46, %v1007_v56 }
 0x265   :  { %v469_v58 = vpop.f32.mrb[2].mxu1  ;;  %v3121_v60 = vpop.f32.mrb[4].mxu0  ;;  %v3144_v3 = vrot.slane %v543_v46, %v3094_v35  ;;  %v3152_v59 = vrot.slane %v543_v46, %v3147_v4  ;;  %v3159_v0 = vrot.slane %v543_v46, %v3108_v43  ;;  %v3165_v10 = vrot.slane %v543_v46, %v3101_v38 }
 0x266   :  { %3951 = vst [vmem:[#allocation12_spill] sm:$0xff] %v3121_v60  ;;  %v3123_v57 = vadd.f32 %v469_v58, %v380_v47  ;;  %v471_v50 = vpop.f32.mrb[3].mxu1  ;;  %v548_v61 = vpop.f32.mrb[5].mxu0  ;;  %1307 = vbcast.lane.b32.xlu1 %v3113_v48, 272  ;;  %1299 = vbcast.lane.b32.xlu0 %v3115_v49, 272  ;;  %v3224_v47 = vld [vmem:[%s3890_s4 + $0x8] sm:$0xff] }
 0x267   :  { %v472_v52 = vadd.f32 %v471_v50, %v3119_v54  ;;  %v549_v9 = vadd.f32 %v548_v61, %v392_v37  ;;  %v555_v13 = vmul.f32 1.442695, %v553_v8 }
 0x268   :  { %v554_v55 = vmin.f32 %v3123_v57, 20.0  ;;  %vm552_vm9 = vcmp.gt.f32.partialorder %v3123_v57, 20.0 }
 0x269   :  { %v3135_v63 = vmul.f32 %v582_v53, %v472_v52  ;;  %v3169_v14 = vrot.slane %v549_v9, %v1040_v41  ;;  %v3173_v16 = vrot.slane %v549_v9, %v1029_v42  ;;  %v3177_v19 = vrot.slane %v549_v9, %v1018_v51 }
 0x26a   :  { %v557_v1 = vmul.f32 1.442695, %v554_v55  ;;  %1311 = vbcast.lane.b32.xlu1 %v3113_v48, 280  ;;  %1291 = vbcast.lane.b32.xlu0 %v3132_v62, 272  ;;  %v3181_v29 = vrot.slane %v549_v9, %v1007_v56  ;;  %v3201_v34 = vrot.slane %v549_v9, %v3094_v35  ;;  %v3219_v35 = vld [vmem:[%s3890_s4] sm:$0xff]  ;;  %v3227_v51 = vrot.slane %v549_v9, %v3147_v4 }
 0x26b   :  { %3952 = vst [vmem:[#allocation13_spill] sm:$0xff] %v3135_v63  ;;  %3954 = vst [vmem:[#allocation15_spill] sm:$0xff] %v3169_v14  ;;  %v3238_v61 = vrot.slane %v549_v9, %v3108_v43  ;;  %v3243_v55 = vrot.slane %v549_v9, %v3101_v38 }
 0x26c   :  { %2663 = vpow2.f32 %v557_v1  ;;  %3955 = vst [vmem:[#allocation16_spill] sm:$0xff] %v3173_v16  ;;  %3956 = vst [vmem:[#allocation17_spill] sm:$0xff] %v3177_v19 }
 0x26d   :  { %3957 = vst [vmem:[#allocation18_spill] sm:$0xff] %v3181_v29 }
 0x26e   :  { %1303 = vbcast.lane.b32.xlu1 %v3115_v49, 280  ;;  %1283 = vbcast.lane.b32.xlu0 %v3139_v2, 272 }
 0x272   :  { %1295 = vbcast.lane.b32.xlu1 %v3132_v62, 280  ;;  %1275 = vbcast.lane.b32.xlu0 %v3144_v3, 272 }
 0x276   :  { %v2664_v5 = vpop.eup %2663  ;;  %1287 = vbcast.lane.b32.xlu1 %v3139_v2, 280  ;;  %1267 = vbcast.lane.b32.xlu0 %v3152_v59, 272 }
 0x277   :  { %v568_v7 = vadd.f32 1.0, %v2664_v5  ;;  %v571_v15 = vmul.f32 -0.5, %v2664_v5  ;;  %v574_v23 = vand.u32 2147483647, %v2664_v5 }
 0x279   :  { %2665 = vlog2.f32 %v568_v7  ;;  %v572_v22 = vadd.f32 1.0, %v571_v15  ;;  %vm575_vm8 = vcmp.lt.f32.partialorder %v574_v23, 0.0004427343 }
 0x27a   :  { %1279 = vbcast.lane.b32.xlu1 %v3144_v3, 280  ;;  %1259 = vbcast.lane.b32.xlu0 %v3159_v0, 272  ;;  %2667 = vpow2.f32 %v555_v13 }
 0x27b   :  { %v573_v26 = vmul.f32 %v2664_v5, %v572_v22 }
 0x27e   :  { %1271 = vbcast.lane.b32.xlu1 %v3152_v59, 280  ;;  %1251 = vbcast.lane.b32.xlu0 %v3165_v10, 272 }
 0x282   :  { %1263 = vbcast.lane.b32.xlu1 %v3159_v0, 280  ;;  %1371 = vbcast.lane.b32.xlu0 %v3169_v14, 272 }
 0x283   :  { %v2666_v17 = vpop.eup %2665 }
 0x284   :  { %v570_v24 = vmul.f32 0.6931472, %v2666_v17  ;;  %v2668_v28 = vpop.eup %2667 }
 0x285   :  { %v559_v36 = vadd.f32 1.0, %v2668_v28  ;;  %v562_v50 = vmul.f32 -0.5, %v2668_v28  ;;  %v565_v56 = vand.u32 2147483647, %v2668_v28 }
 0x286   :  { %1255 = vbcast.lane.b32.xlu1 %v3165_v10, 280  ;;  %1363 = vbcast.lane.b32.xlu0 %v3173_v16, 272  ;;  %v576_v27 = vsel %vm575_vm8, %v573_v26, %v570_v24 }
 0x287   :  { %v3188_v33 = vsel %vm552_vm9, %v3123_v57, %v576_v27  ;;  %2669 = vlog2.f32 %v559_v36  ;;  %v563_v53 = vadd.f32 1.0, %v562_v50  ;;  %vm566_vm10 = vcmp.lt.f32.partialorder %v565_v56, 0.0004427343 }
 0x288   :  { %v3194_v37 = vrot.slane %v3188_v33, %v3184_v31  ;;  %v3198_v39 = vmul.f32 %v3188_v33, %v3087_v32 }
 0x289   :  { %v564_v5 = vmul.f32 %v2668_v28, %v563_v53 }
 0x28a   :  { %1375 = vbcast.lane.b32.xlu1 %v3169_v14, 280  ;;  %1355 = vbcast.lane.b32.xlu0 %v3177_v19, 272  ;;  %v3205_v41 = vrot.slane %v3194_v37, %v3184_v31  ;;  %v919_v42 = vrot.slane %v3198_v39, %v3184_v31 }
 0x28c   :  { %v718_v45 = vrot.slane %v3205_v41, %v3101_v38  ;;  %v3214_v46 = vrot.slane %v919_v42, %v3184_v31  ;;  %v927_v8 = vcombine.high %v919_v42, %v919_v42 }
 0x28e   :  { %1367 = vbcast.lane.b32.xlu1 %v3173_v16, 280  ;;  %1347 = vbcast.lane.b32.xlu0 %v3181_v29, 272  ;;  %v3230_v58 = vmul.f32 %v718_v45, %v3219_v35  ;;  %v3233_v57 = vmul.f32 %v718_v45, %v3224_v47  ;;  %v3252_v13 = vrot.slane %v927_v8, %v3184_v31 }
 0x28f   :  { %v634_v45 = vcombine.high %v3188_v33, %v3188_v33 }
 0x291   :  { %v2670_v52 = vpop.eup %2669 }
 0x292   :  { %1359 = vbcast.lane.b32.xlu1 %v3177_v19, 280  ;;  %1339 = vbcast.lane.b32.xlu0 %v3201_v34, 272  ;;  %v561_v1 = vmul.f32 0.6931472, %v2670_v52 }
 0x294   :  { %v567_v7 = vsel %vm566_vm10, %v564_v5, %v561_v1 }
 0x295   :  { %v577_v43 = vsel %vm551_vm11, %v3156_v6, %v567_v7 }
 0x296   :  { %1351 = vbcast.lane.b32.xlu1 %v3181_v29, 280  ;;  %1331 = vbcast.lane.b32.xlu0 %v3227_v51, 272  ;;  %v585_v9 = vcombine.high %v577_v43, %v577_v43  ;;  %v859_v23 = vmul.f32 %v577_v43, %v3081_v30  ;;  %v592_v6 = vrot.slane %v577_v43, %v3184_v31 }
 0x297   :  { %v648_v43 = vrot.slane %v634_v45, %v3184_v31 }
 0x298   :  { %v599_v15 = vrot.slane %v585_v9, %v3184_v31  ;;  %v863_v26 = vcombine.high %v859_v23, %v859_v23  ;;  %v600_v28 = vcombine.high %v592_v6, %v592_v6  ;;  %v608_v5 = vrot.slane %v592_v6, %v3184_v31 }
 0x299   :  { %v650_v6 = vcombine.high %v648_v43, %v648_v43  ;;  %v3320_v12 = vrot.slane %v648_v43, %v3184_v31 }
 0x29a   :  { %1343 = vbcast.lane.b32.xlu1 %v3201_v34, 280  ;;  %1323 = vbcast.lane.b32.xlu0 %v3238_v61, 272  ;;  %v601_v17 = vcombine.high %v599_v15, %v599_v15  ;;  %v615_v22 = vrot.slane %v599_v15, %v3184_v31  ;;  %v877_v42 = vrot.slane %v863_v26, %v3184_v31 }
 0x29b   :  { %v622_v56 = vrot.slane %v600_v28, %v3184_v31 }
 0x29c   :  { %v629_v18 = vrot.slane %v601_v17, %v3184_v31  ;;  %v631_v25 = vcombine.high %v615_v22, %v615_v22  ;;  %v879_v7 = vcombine.high %v877_v42, %v877_v42  ;;  %v702_v9 = vrot.slane %v615_v22, %v3101_v38 }
 0x29d   :  { %v632_v15 = vcombine.high %v622_v56, %v622_v56 }
 0x29e   :  { %1335 = vbcast.lane.b32.xlu1 %v3227_v51, 280  ;;  %1315 = vbcast.lane.b32.xlu0 %v3243_v55, 272  ;;  %v633_v21 = vcombine.high %v629_v18, %v629_v18  ;;  %v710_v36 = vrot.slane %v631_v25, %v3101_v38  ;;  %v706_v53 = vrot.slane %v629_v18, %v3101_v38 }
 0x29f   :  { %v686_v18 = vrot.slane %v608_v5, %v3101_v38  ;;  %v630_v25 = vcombine.high %v608_v5, %v608_v5  ;;  %v771_v26 = vmul.f32 %v702_v9, %v3219_v35  ;;  %v698_v28 = vrot.slane %v632_v15, %v3101_v38 }
 0x2a0   :  { %v714_v24 = vrot.slane %v633_v21, %v3101_v38  ;;  %v775_v1 = vmul.f32 %v710_v36, %v3219_v35  ;;  %v773_v33 = vmul.f32 %v706_v53, %v3219_v35  ;;  %v776_v21 = vmul.f32 %v710_v36, %v3224_v47 }
 0x2a1   :  { %v774_v36 = vmul.f32 %v706_v53, %v3224_v47  ;;  %v694_v5 = vrot.slane %v630_v25, %v3101_v38 }
 0x2a2   :  { %1327 = vbcast.lane.b32.xlu1 %v3238_v61, 280  ;;  %v777_v27 = vmul.f32 %v714_v24, %v3219_v35  ;;  %v778_v52 = vmul.f32 %v714_v24, %v3224_v47  ;;  %v819_v17 = vmul.f32 1.442695, %v775_v1  ;;  %v3276_v24 = vrot.slane %v879_v7, %v3184_v31 }
 0x2a3   :  { %v815_v22 = vmul.f32 1.442695, %v773_v33  ;;  %v821_v45 = vmul.f32 1.442695, %v776_v21  ;;  %v3288_v1 = vrot.slane %v877_v42, %v3184_v31  ;;  %v3293_v7 = vrot.slane %v650_v6, %v3184_v31 }
 0x2a4   :  { %v823_v50 = vmul.f32 1.442695, %v777_v27  ;;  %v825_v8 = vmul.f32 1.442695, %v778_v52  ;;  %v3280_v27 = vrot.slane %v859_v23, %v3184_v31  ;;  %v911_v52 = vcombine.high %v3276_v24, %v3276_v24 }
 0x2a5   :  { %v772_v23 = vmul.f32 %v702_v9, %v3224_v47  ;;  %v811_v33 = vmul.f32 1.442695, %v771_v26  ;;  %v769_v42 = vmul.f32 %v698_v28, %v3219_v35  ;;  %v764_v6 = vmul.f32 %v686_v18, %v3224_v47 }
 0x2a6   :  { %1319 = vbcast.lane.b32.xlu1 %v3243_v55, 280  ;;  %2671 = vpow2.f32 %v823_v50  ;;  %v763_v50 = vmul.f32 %v686_v18, %v3219_v35  ;;  %v878_v15 = vcombine.high %v3280_v27, %v3280_v27  ;;  %v3303_v9 = vrot.slane %v3280_v27, %v3184_v31 }
 0x2a7   :  { %2673 = vpow2.f32 %v825_v8  ;;  %v690_v8 = vrot.slane %v622_v56, %v3101_v38  ;;  %v3306_v25 = vrot.slane %v911_v52, %v3101_v38  ;;  %v909_v56 = vcombine.high %v3288_v1, %v3288_v1 }
 0x2a8   :  { %2675 = vpow2.f32 %v819_v17  ;;  %v817_v17 = vmul.f32 1.442695, %v774_v36  ;;  %v795_v21 = vmul.f32 1.442695, %v763_v50  ;;  %v767_v26 = vmul.f32 %v694_v5, %v3219_v35 }
 0x2a9   :  { %2677 = vpow2.f32 %v815_v22  ;;  %3959 = vst [vmem:[#allocation20_spill] sm:$0xff] %v3306_v25  ;;  %v813_v22 = vmul.f32 1.442695, %v772_v23  ;;  %v765_v20 = vmul.f32 %v690_v8, %v3219_v35  ;;  %v807_v18 = vmul.f32 1.442695, %v769_v42 }
 0x2aa   :  { %2679 = vpow2.f32 %v821_v45  ;;  %v682_v45 = vcombine.high %v3293_v7, %v3293_v7  ;;  %v770_v23 = vmul.f32 %v698_v28, %v3224_v47  ;;  %v766_v30 = vmul.f32 %v690_v8, %v3224_v47 }
 0x2ab   :  { %2681 = vpow2.f32 %v811_v33  ;;  %v3327_v63 = vrot.slane %v909_v56, %v3101_v38  ;;  %v768_v33 = vmul.f32 %v694_v5, %v3224_v47  ;;  %v803_v44 = vmul.f32 1.442695, %v767_v26 }
 0x2ac   :  { %2683 = vpow2.f32 %v817_v17  ;;  %v3333_v43 = vrot.slane %v682_v45, %v3101_v38  ;;  %v912_v5 = vcombine.high %v3198_v39, %v3198_v39  ;;  %v809_v26 = vmul.f32 1.442695, %v770_v23 }
 0x2ad   :  { %2685 = vpow2.f32 %v795_v21  ;;  %3961 = vst [vmem:[#allocation22_spill] sm:$0xff] %v3327_v63 }
 0x2ae   :  { %2687 = vpow2.f32 %v813_v22  ;;  %v793_v23 = vmul.f32 %v3333_v43, %v3219_v35 }
 0x2af   :  { %2689 = vpow2.f32 %v807_v18 }
 0x2b0   :  { %v3296_v53 = vpop.eup %2671  ;;  %2691 = vpow2.f32 %v803_v44 }
 0x2b1   :  { %3958 = vst [vmem:[#allocation19_spill] sm:$0xff] %v3296_v53  ;;  %v1417_v52 = vmul.f32 0.0, %v3296_v53  ;;  %v3317_v32 = vpop.eup %2673  ;;  %v797_v53 = vmul.f32 1.442695, %v764_v6  ;;  %2693 = vpow2.f32 %v809_v26 }
 0x2b2   :  { %3960 = vst [vmem:[#allocation21_spill] sm:$0xff] %v3317_v32  ;;  %v1418_v56 = vmul.f32 0.0, %v3317_v32  ;;  %v799_v32 = vmul.f32 1.442695, %v765_v20  ;;  %v926_v20 = vrot.slane %v912_v5, %v3184_v31  ;;  %v649_v5 = vcombine.high %v3194_v37, %v3194_v37 }
 0x2b3   :  { %v738_v37 = vrot.slane %v3293_v7, %v3101_v38  ;;  %v734_v7 = vrot.slane %v3320_v12, %v3101_v38 }
 0x2b4   :  { %2695 = vpow2.f32 %v799_v32 }
 0x2b5   :  { %v789_v60 = vmul.f32 %v738_v37, %v3219_v35 }
 0x2d8   :  { %v1308_v36 = vpop.permute.xlu1 %1307  ;;  %v1300_v50 = vpop.permute.xlu0 %1299 }
 0x2d9   :  { %v1391_v27 = vmul.f32 %v1308_v36, %v3306_v25  ;;  %v3329_v36 = vpop.eup %2675  ;;  %v1389_v8 = vmul.f32 %v1300_v50, %v3327_v63  ;;  %v3352_v50 = vrot.slane %v3276_v24, %v3101_v38 }
 0x2da   :  { %3962 = vst [vmem:[#allocation23_spill] sm:$0xff] %v3329_v36  ;;  %v3344_v45 = vpop.eup %2677 }
 0x2db   :  { %v3324_v11 = vadd.f32 %v1417_v52, %v1391_v27  ;;  %v680_v27 = vcombine.high %v3320_v12, %v3320_v12  ;;  %3963 = vst [vmem:[#allocation24_spill] sm:$0xff] %v3344_v45  ;;  %3964 = vst [vmem:[#allocation25_spill] sm:$0xff] %v3352_v50  ;;  %v3357_v54 = vpop.eup %2679 }
 0x2dc   :  { %v1312_v17 = vpop.permute.xlu1 %1311  ;;  %v1292_v42 = vpop.permute.xlu0 %1291  ;;  %3965 = vst [vmem:[#allocation26_spill] sm:$0xff] %v3357_v54 }
 0x2dd   :  { %v1433_v28 = vmul.f32 %v3329_v36, %v3324_v11  ;;  %v1392_v21 = vmul.f32 %v1312_v17, %v3306_v25  ;;  %v3355_v17 = vrot.slane %v878_v15, %v3184_v31  ;;  %v3368_v6 = vrot.slane %v680_v27, %v3101_v38  ;;  %v3371_v44 = vpop.eup %2681 }
 0x2de   :  { %3966 = vst [vmem:[#allocation27_spill] sm:$0xff] %v3371_v44  ;;  %v801_v27 = vmul.f32 1.442695, %v766_v30 }
 0x2df   :  { %v3346_v22 = vadd.f32 %v1433_v28, %v1389_v8  ;;  %v3348_v52 = vadd.f32 %v1418_v56, %v1392_v21  ;;  %v1387_v8 = vmul.f32 %v1292_v42, %v3352_v50  ;;  %v805_v21 = vmul.f32 1.442695, %v768_v33  ;;  %v3383_v33 = vpop.eup %2683 }
 0x2e0   :  { %v1304_v39 = vpop.permute.xlu1 %1303  ;;  %v1284_v18 = vpop.permute.xlu0 %1283  ;;  %v3379_v42 = vrot.slane %v3288_v1, %v3101_v38  ;;  %3968 = vst [vmem:[#allocation29_spill] sm:$0xff] %v3383_v33  ;;  %v791_v32 = vmul.f32 %v3368_v6, %v3219_v35 }
 0x2e1   :  { %v1449_v28 = vmul.f32 %v3344_v45, %v3346_v22  ;;  %v1390_v24 = vmul.f32 %v1304_v39, %v3327_v63  ;;  %v1434_v15 = vmul.f32 %v3357_v54, %v3348_v52  ;;  %v910_v39 = vcombine.high %v3355_v17, %v3355_v17 }
 0x2e2   :  { %3967 = vst [vmem:[#allocation28_spill] sm:$0xff] %v3379_v42  ;;  %v1385_v1 = vmul.f32 %v1284_v18, %v3379_v42  ;;  %v928_v63 = vcombine.high %v926_v20, %v926_v20  ;;  %2697 = vpow2.f32 %v805_v21  ;;  %v851_v12 = vmul.f32 1.442695, %v791_v32 }
 0x2e3   :  { %v3373_v56 = vadd.f32 %v1449_v28, %v1387_v8  ;;  %v3375_v25 = vadd.f32 %v1434_v15, %v1390_v24  ;;  %v855_v28 = vmul.f32 1.442695, %v793_v23  ;;  %v3387_v8 = vpop.eup %2685  ;;  %v3406_v18 = vrot.slane %v910_v39, %v3101_v38 }
 0x2e4   :  { %v1296_v26 = vpop.permute.xlu1 %1295  ;;  %v1276_v36 = vpop.permute.xlu0 %1275  ;;  %3969 = vst [vmem:[#allocation30_spill] sm:$0xff] %v3387_v8 }
 0x2e5   :  { %v1465_v24 = vmul.f32 %v3371_v44, %v3373_v56  ;;  %v1388_v15 = vmul.f32 %v1296_v26, %v3352_v50  ;;  %v1450_v54 = vmul.f32 %v3383_v33, %v3375_v25  ;;  %v3395_v30 = vpop.eup %2687  ;;  %3971 = vst [vmem:[#allocation32_spill] sm:$0xff] %v3406_v18  ;;  %v908_v26 = vcombine.high %v3303_v9, %v3303_v9 }
 0x2e6   :  { %3970 = vst [vmem:[#allocation31_spill] sm:$0xff] %v3395_v30  ;;  %v3410_v33 = vpop.eup %2689  ;;  %v3413_v50 = vrot.slane %v649_v5, %v3184_v31  ;;  %2699 = vpow2.f32 %v855_v28 }
 0x2e7   :  { %v3401_v23 = vadd.f32 %v1465_v24, %v1385_v1  ;;  %v3403_v45 = vadd.f32 %v1450_v54, %v1388_v15  ;;  %3972 = vst [vmem:[#allocation33_spill] sm:$0xff] %v3410_v33  ;;  %v794_v54 = vmul.f32 %v3333_v43, %v3224_v47  ;;  %v1383_v24 = vmul.f32 %v1276_v36, %v3406_v18  ;;  %v3425_v15 = vpop.eup %2691 }
 0x2e8   :  { %v1288_v21 = vpop.permute.xlu1 %1287  ;;  %v1268_v44 = vpop.permute.xlu0 %1267  ;;  %3973 = vst [vmem:[#allocation34_spill] sm:$0xff] %v3425_v15  ;;  %2701 = vpow2.f32 %v801_v27  ;;  %v3433_v43 = vrot.slane %v908_v26, %v3101_v38  ;;  %v3436_v36 = vrot.slane %v928_v63, %v3184_v31  ;;  %v787_v27 = vmul.f32 %v734_v7, %v3219_v35 }
 0x2e9   :  { %v1481_v39 = vmul.f32 %v3410_v33, %v3401_v23  ;;  %v1386_v1 = vmul.f32 %v1288_v21, %v3379_v42  ;;  %v1466_v5 = vmul.f32 %v3395_v30, %v3403_v45  ;;  %v3438_v21 = vpop.eup %2693  ;;  %2703 = vpow2.f32 %v797_v53 }
 0x2ea   :  { %3974 = vst [vmem:[#allocation35_spill] sm:$0xff] %v3433_v43  ;;  %3975 = vst [vmem:[#allocation36_spill] sm:$0xff] %v3438_v21  ;;  %v681_v30 = vcombine.high %v3413_v50, %v3413_v50  ;;  %v1381_v26 = vmul.f32 %v1268_v44, %v3433_v43  ;;  %2705 = vpow2.f32 %v851_v12  ;;  %v3452_v53 = vrot.slane %v926_v20, %v3184_v31 }
 0x2eb   :  { %v3428_v28 = vadd.f32 %v1481_v39, %v1383_v24  ;;  %v3430_v40 = vadd.f32 %v1466_v5, %v1386_v1  ;;  %v857_v39 = vmul.f32 1.442695, %v794_v54  ;;  %v3449_v5 = vpop.eup %2695  ;;  %v847_v33 = vmul.f32 1.442695, %v789_v60 }
 0x2ec   :  { %v1280_v32 = vpop.permute.xlu1 %1279  ;;  %v1260_v42 = vpop.permute.xlu0 %1259  ;;  %3976 = vst [vmem:[#allocation37_spill] sm:$0xff] %v3449_v5  ;;  %v792_v54 = vmul.f32 %v3368_v6, %v3224_v47  ;;  %v3462_v44 = vrot.slane %v3355_v17, %v3101_v38  ;;  %v679_v31 = vcombine.high %v3205_v41, %v3205_v41  ;;  %v3471_v60 = vrot.slane %v681_v30, %v3101_v38 }
 0x2ed   :  { %v1497_v24 = vmul.f32 %v3425_v15, %v3428_v28  ;;  %v1384_v1 = vmul.f32 %v1280_v32, %v3406_v18  ;;  %v1482_v63 = vmul.f32 %v3438_v21, %v3430_v40  ;;  %v960_v32 = vcombine.high %v3436_v36, %v3436_v36  ;;  %v3466_v21 = vpop.eup %2697 }
 0x2ee   :  { %3977 = vst [vmem:[#allocation38_spill] sm:$0xff] %v3462_v44  ;;  %3978 = vst [vmem:[#allocation39_spill] sm:$0xff] %v3466_v21  ;;  %2707 = vpow2.f32 %v857_v39  ;;  %v1379_v17 = vmul.f32 %v1260_v42, %v3462_v44  ;;  %v958_v41 = vcombine.high %v3452_v53, %v3452_v53  ;;  %v853_v30 = vmul.f32 1.442695, %v792_v54 }
 0x2ef   :  { %v3456_v4 = vadd.f32 %v1497_v24, %v1381_v26  ;;  %v3458_v15 = vadd.f32 %v1482_v63, %v1384_v1  ;;  %2709 = vpow2.f32 %v847_v33  ;;  %v790_v63 = vmul.f32 %v738_v37, %v3224_v47 }
 0x2f0   :  { %v1272_v6 = vpop.permute.xlu1 %1271  ;;  %v1252_v20 = vpop.permute.xlu0 %1251  ;;  %v843_v39 = vmul.f32 1.442695, %v787_v27  ;;  %v3487_v42 = vrot.slane %v960_v32, %v3101_v38  ;;  %v3497_v33 = vrot.slane %v3303_v9, %v3101_v38  ;;  %v785_v27 = vmul.f32 %v3471_v60, %v3219_v35 }
 0x2f1   :  { %v1513_v12 = vmul.f32 %v3449_v5, %v3456_v4  ;;  %v1382_v24 = vmul.f32 %v1272_v6, %v3433_v43  ;;  %v1498_v26 = vmul.f32 %v3466_v21, %v3458_v15  ;;  %v3479_v1 = vpop.eup %2699  ;;  %v3492_v21 = vrot.slane %v679_v31, %v3101_v38 }
 0x2f2   :  { %3979 = vst [vmem:[#allocation40_spill] sm:$0xff] %v3479_v1  ;;  %v3489_v6 = vpop.eup %2701  ;;  %v788_v43 = vmul.f32 %v734_v7, %v3224_v47  ;;  %v3509_v7 = vrot.slane %v958_v41, %v3101_v38  ;;  %2711 = vpow2.f32 %v853_v30  ;;  %v849_v9 = vmul.f32 1.442695, %v790_v63 }
 0x2f3   :  { %v1517_v18 = vadd.f32 %v1513_v12, %v1379_v17  ;;  %v3484_v14 = vadd.f32 %v1498_v26, %v1382_v24  ;;  %3980 = vst [vmem:[#allocation41_spill] sm:$0xff] %v3489_v6  ;;  %v1419_v17 = vmul.f32 0.0, %v3479_v1  ;;  %v3506_v24 = vpop.eup %2703  ;;  %2713 = vpow2.f32 %v843_v39 }
 0x2f4   :  { %v1264_v54 = vpop.permute.xlu1 %1263  ;;  %v1372_v37 = vpop.permute.xlu0 %1371  ;;  %v1377_v41 = vmul.f32 %v1252_v20, %v3497_v33  ;;  %2715 = vpow2.f32 %v849_v9 }
 0x2f5   :  { %v1380_v12 = vmul.f32 %v1264_v54, %v3462_v44  ;;  %v1514_v32 = vmul.f32 %v3489_v6, %v3484_v14  ;;  %v1407_v31 = vmul.f32 %v1372_v37, %v3487_v42  ;;  %v1529_v26 = vmul.f32 %v3387_v8, %v1517_v18  ;;  %v3516_v1 = vpop.eup %2705 }
 0x2f6   :  { %v3934_v54 = vmov 0.0|0.0   ;;  %3981 = vst [vmem:[#allocation42_spill] sm:$0xff] %v3516_v1  ;;  %v783_v37 = vmul.f32 %v3492_v21, %v3219_v35  ;;  %v839_v6 = vmul.f32 1.442695, %v785_v27  ;;  %v845_v44 = vmul.f32 1.442695, %v788_v43 }
 0x2f7   :  { %v1518_v5 = vadd.f32 %v1514_v32, %v1380_v12  ;;  %v3512_v16 = vadd.f32 %v1419_v17, %v1407_v31  ;;  %2479 = vmatprep.subr.bf16.mxu0 %v3934_v54  ;;  %2455 = vmatprep.subr.bf16.mxu1 %v3934_v54  ;;  %v722_v54 = vrot.slane %v3413_v50, %v3101_v38 }
 0x2f8   :  { %v1256_v30 = vpop.permute.xlu1 %1255  ;;  %v1364_v63 = vpop.permute.xlu0 %1363  ;;  %v1533_v20 = vadd.f32 %v1529_v26, %v1377_v41  ;;  %2717 = vpow2.f32 %v839_v6  ;;  %v786_v50 = vmul.f32 %v3471_v60, %v3224_v47 }
 0x2f9   :  { %v1378_v12 = vmul.f32 %v1256_v30, %v3497_v33  ;;  %v1530_v32 = vmul.f32 %v3506_v24, %v1518_v5  ;;  %v1435_v39 = vmul.f32 %v3516_v1, %v3512_v16  ;;  %v1405_v17 = vmul.f32 %v1364_v63, %v3509_v7  ;;  %v3526_v31 = vpop.eup %2707 }
 0x2fa   :  { %v2580_v8 = vpack.i.bf16 %v1518_v5, %v1517_v18  ;;  %v3532_v27 = vpop.eup %2709  ;;  %v835_v30 = vmul.f32 1.442695, %v783_v37  ;;  %v3537_v63 = vrot.slane %v3436_v36, %v3101_v38  ;;  %v1420_v43 = vmul.f32 0.0, %v3526_v31 }
 0x2fb   :  { %v1534_v19 = vadd.f32 %v1530_v32, %v1378_v12  ;;  %v3530_v29 = vadd.f32 %v1435_v39, %v1405_v17  ;;  %v2590_v37 = vpack.i.bf16 %v3458_v15, %v3428_v28  ;;  %2719 = vpow2.f32 %v845_v44 }
 0x2fc   :  { %2581 = vrot.lane.b32.xlu1 %v2580_v8, %s2769_s11  ;;  %v1376_v1 = vpop.permute.xlu1 %1375  ;;  %v1356_v9 = vpop.permute.xlu0 %1355  ;;  %2721 = vpow2.f32 %v835_v30  ;;  %v3563_v28 = vrot.slane %v3452_v53, %v3101_v38  ;;  %v2585_v44 = vpack.i.bf16 %v3484_v14, %v3456_v4  ;;  %v784_v12 = vmul.f32 %v3492_v21, %v3224_v47 }
 0x2fd   :  { %v1408_v18 = vmul.f32 %v1376_v1, %v3487_v42  ;;  %v1451_v5 = vmul.f32 %v3532_v27, %v3530_v29  ;;  %v2575_v26 = vpack.i.bf16 %v1534_v19, %v1533_v20  ;;  %v1403_v8 = vmul.f32 %v1356_v9, %v3537_v63  ;;  %v3551_v60 = vpop.eup %2711 }
 0x2fe   :  { %v781_v1 = vmul.f32 %v722_v54, %v3219_v35  ;;  %v841_v19 = vmul.f32 1.442695, %v786_v50  ;;  %v3557_v41 = vpop.eup %2713  ;;  %v959_v35 = vcombine.high %v3252_v13, %v3252_v13  ;;  %v2600_v20 = vpack.i.bf16 %v3403_v45, %v3373_v56 }
 0x2ff   :  { %v3548_v36 = vadd.f32 %v1420_v43, %v1408_v18  ;;  %2576 = vrot.lane.b32.xlu0 %v2575_v26, %s2769_s11  ;;  %v3554_v6 = vadd.f32 %v1451_v5, %v1403_v8  ;;  %v3579_v14 = vpop.eup %2715  ;;  %v2595_v45 = vpack.i.bf16 %v3430_v40, %v3401_v23  ;;  %v782_v43 = vmul.f32 %v722_v54, %v3224_v47 }
 0x300   :  { %2591 = vrot.lane.b32.xlu1 %v2590_v37, %s2769_s11  ;;  %v1368_v32 = vpop.permute.xlu1 %1367  ;;  %v1348_v17 = vpop.permute.xlu0 %1347  ;;  %v831_v4 = vmul.f32 1.442695, %v781_v1  ;;  %2723 = vpow2.f32 %v841_v19  ;;  %v3586_v18 = vrot.slane %v959_v35, %v3101_v38  ;;  %v837_v5 = vmul.f32 1.442695, %v784_v12 }
 0x301   :  { %v1436_v15 = vmul.f32 %v3551_v60, %v3548_v36  ;;  %v1467_v39 = vmul.f32 %v3557_v41, %v3554_v6  ;;  %v1406_v53 = vmul.f32 %v1368_v32, %v3509_v7  ;;  %v1401_v30 = vmul.f32 %v1348_v17, %v3563_v28 }
 0x302   :  { %v3590_v56 = vpop.eup %2717  ;;  %v2610_v8 = vpack.i.bf16 %v3348_v52, %v3324_v11  ;;  %v957_v37 = vcombine.high %v3214_v46, %v3214_v46  ;;  %2725 = vpow2.f32 %v831_v4  ;;  %v2605_v54 = vpack.i.bf16 %v3375_v25, %v3346_v22 }
 0x303   :  { %2586 = vrot.lane.b32.xlu0 %v2585_v44, %s2769_s11  ;;  %v3581_v21 = vadd.f32 %v1436_v15, %v1406_v53  ;;  %v3583_v50 = vadd.f32 %v1467_v39, %v1401_v30  ;;  %v833_v44 = vmul.f32 1.442695, %v782_v43  ;;  %2727 = vpow2.f32 %v837_v5 }
 0x304   :  { %2601 = vrot.lane.b32.xlu1 %v2600_v20, %s2769_s11  ;;  %v1360_v9 = vpop.permute.xlu1 %1359  ;;  %v1340_v26 = vpop.permute.xlu0 %1339  ;;  %v3614_v12 = vrot.slane %v957_v37, %v3101_v38  ;;  %v827_v25 = vmul.f32 1.442695, %v3230_v58  ;;  %v829_v4 = vmul.f32 1.442695, %v3233_v57 }
 0x305   :  { %v1404_v1 = vmul.f32 %v1360_v9, %v3537_v63  ;;  %v1452_v19 = vmul.f32 %v3579_v14, %v3581_v21  ;;  %v1483_v40 = vmul.f32 %v3590_v56, %v3583_v50  ;;  %v1399_v23 = vmul.f32 %v1340_v26, %v3586_v18  ;;  %v3605_v47 = vpop.eup %2719 }
 0x306   :  { %v3611_v15 = vpop.eup %2721  ;;  %2729 = vpow2.f32 %v833_v44 }
 0x307   :  { %2596 = vrot.lane.b32.xlu0 %v2595_v45, %s2769_s11  ;;  %v3607_v11 = vadd.f32 %v1452_v19, %v1404_v1  ;;  %v1487_v52 = vadd.f32 %v1483_v40, %v1399_v23  ;;  %2731 = vpow2.f32 %v827_v25 }
 0x308   :  { %2611 = vrot.lane.b32.xlu1 %v2610_v8, %s2769_s11  ;;  %v1352_v35 = vpop.permute.xlu1 %1351  ;;  %v1332_v20 = vpop.permute.xlu0 %1331  ;;  %v3630_v8 = vrot.slane %v3252_v13, %v3101_v38  ;;  %2733 = vpow2.f32 %v829_v4 }
 0x309   :  { %v1402_v32 = vmul.f32 %v1352_v35, %v3563_v28  ;;  %v1468_v39 = vmul.f32 %v3605_v47, %v3607_v11  ;;  %v1499_v17 = vmul.f32 %v3611_v15, %v1487_v52  ;;  %v1397_v22 = vmul.f32 %v1332_v20, %v3614_v12 }
 0x30a   :  { %v3623_v30 = vpop.eup %2723 }
 0x30b   :  { %2606 = vrot.lane.b32.xlu0 %v2605_v54, %s2769_s11  ;;  %v1472_v53 = vadd.f32 %v1468_v39, %v1402_v32  ;;  %v1503_v45 = vadd.f32 %v1499_v17, %v1397_v22  ;;  %v3644_v17 = vrot.slane %v3214_v46, %v3101_v38  ;;  %v3982_v22 = vmov 0.0  }
 0x30c   :  { %v1344_v5 = vpop.permute.xlu1 %1343  ;;  %v1324_v9 = vpop.permute.xlu0 %1323  ;;  %2291 = vmatprep.mubr.msk.f32.mxu0 %vm2773_vm12, %v3982_v22  ;;  %2256 = vmatprep.mubr.msk.f32.mxu1 %vm2773_vm12, %v3982_v22 }
 0x30d   :  { %v1484_v43 = vmul.f32 %v3623_v30, %v1472_v53  ;;  %v1400_v26 = vmul.f32 %v1344_v5, %v3586_v18  ;;  %v3632_v58 = vpop.eup %2725  ;;  %v1395_v57 = vmul.f32 %v1324_v9, %v3630_v8 }
 0x30e   :  { %v1515_v1 = vmul.f32 %v3632_v58, %v1503_v45  ;;  %v3636_v19 = vpop.eup %2727 }
 0x30f   :  { %v1488_v37 = vadd.f32 %v1484_v43, %v1400_v26 }
 0x310   :  { %v1336_v40 = vpop.permute.xlu1 %1335  ;;  %v1519_v44 = vadd.f32 %v1515_v1, %v1395_v57  ;;  %v3640_v32 = vpop.eup %2729 }
 0x311   :  { %v1398_v23 = vmul.f32 %v1336_v40, %v3614_v12  ;;  %v1500_v54 = vmul.f32 %v3636_v19, %v1488_v37  ;;  %v1316_v13 = vpop.permute.xlu0 %1315  ;;  %v3652_v4 = vpop.eup %2731 }
 0x312   :  { %v1531_v43 = vmul.f32 %v3652_v4, %v1519_v44  ;;  %v1393_v5 = vmul.f32 %v1316_v13, %v3644_v17  ;;  %v3656_v38 = vpop.eup %2733  ;;  %v2640_v13 = vpack.i.bf16 %v3607_v11, %v3554_v6  ;;  %v2645_v6 = vpack.i.bf16 %v3581_v21, %v3530_v29 }
 0x313   :  { %v1504_v35 = vadd.f32 %v1500_v54, %v1398_v23  ;;  %v2630_v54 = vpack.i.bf16 %v1488_v37, %v1487_v52  ;;  %v2650_v52 = vpack.i.bf16 %v3548_v36, %v3512_v16 }
 0x314   :  { %v1328_v39 = vpop.permute.xlu1 %1327  ;;  %v1535_v40 = vadd.f32 %v1531_v43, %v1393_v5 }
 0x315   :  { %v1396_v20 = vmul.f32 %v1328_v39, %v3630_v8  ;;  %v1516_v25 = vmul.f32 %v3640_v32, %v1504_v35 }
 0x317   :  { %v1520_v9 = vadd.f32 %v1516_v25, %v1396_v20  ;;  %v2625_v20 = vpack.i.bf16 %v1504_v35, %v1503_v45 }
 0x318   :  { %v1320_v46 = vpop.permute.xlu1 %1319 }
 0x319   :  { %v1394_v26 = vmul.f32 %v1320_v46, %v3644_v17  ;;  %v1532_v1 = vmul.f32 %v3656_v38, %v1520_v9  ;;  %v2620_v57 = vpack.i.bf16 %v1520_v9, %v1519_v44  ;;  %v2635_v44 = vpack.i.bf16 %v1472_v53, %v3583_v50 }
 0x31b   :  { %v1536_v23 = vadd.f32 %v1532_v1, %v1394_v26  ;;  %2621 = vrot.lane.b32.xlu1 %v2620_v57, %s2769_s11 }
 0x31d   :  { %v2615_v39 = vpack.i.bf16 %v1536_v23, %v1535_v40 }
 0x31f   :  { %2631 = vrot.lane.b32.xlu1 %v2630_v54, %s2769_s11  ;;  %2616 = vrot.lane.b32.xlu0 %v2615_v39, %s2769_s11  ;;  %v2743_v39 = vld [vmem:[%s3889_s3 + $0x200] ss:$8 sm:$0xf] }
 0x323   :  { %2641 = vrot.lane.b32.xlu1 %v2640_v13, %s2769_s11  ;;  %2626 = vrot.lane.b32.xlu0 %v2625_v20, %s2769_s11  ;;  %v3988_v13 = vld [vmem:[#allocation14_spill] sm:$0xff] }
 0x324   :  { %v3716_v20 = vrot.slane %v2743_v39, %v3988_v13 }
 0x327   :  { %970 = vbcast.lane.b32.xlu1 %v3165_v10, 264  ;;  %2636 = vrot.lane.b32.xlu0 %v2635_v44, %s2769_s11 }
 0x32b   :  { %977 = vbcast.lane.b32.xlu1 %v3159_v0, 256  ;;  %966 = vbcast.lane.b32.xlu0 %v3165_v10, 256 }
 0x32f   :  { %2651 = vrot.lane.b32.xlu1 %v2650_v52, %s2769_s11  ;;  %2646 = vrot.lane.b32.xlu0 %v2645_v6, %s2769_s11 }
 0x333   :  { %992 = vbcast.lane.b32.xlu1 %v3152_v59, 264  ;;  %981 = vbcast.lane.b32.xlu0 %v3159_v0, 264 }
 0x337   :  { %1003 = vbcast.lane.b32.xlu1 %v3144_v3, 264  ;;  %988 = vbcast.lane.b32.xlu0 %v3152_v59, 256 }
 0x33b   :  { %1014 = vbcast.lane.b32.xlu1 %v3139_v2, 264  ;;  %999 = vbcast.lane.b32.xlu0 %v3144_v3, 256 }
 0x33f   :  { %1025 = vbcast.lane.b32.xlu1 %v3132_v62, 264  ;;  %1010 = vbcast.lane.b32.xlu0 %v3139_v2, 256  ;;  %v3986_v2 = vld [vmem:[#allocation15_spill] sm:$0xff] }
 0x343   :  { %1036 = vbcast.lane.b32.xlu1 %v3115_v49, 264  ;;  %1021 = vbcast.lane.b32.xlu0 %v3132_v62, 256  ;;  %v3983_v62 = vld [vmem:[#allocation18_spill] sm:$0xff] }
 0x347   :  { %1047 = vbcast.lane.b32.xlu1 %v3113_v48, 264  ;;  %1032 = vbcast.lane.b32.xlu0 %v3115_v49, 256  ;;  %v3984_v49 = vld [vmem:[#allocation17_spill] sm:$0xff] }
 0x34b   :  { %1058 = vbcast.lane.b32.xlu1 %v3243_v55, 264  ;;  %1043 = vbcast.lane.b32.xlu0 %v3113_v48, 256  ;;  %v3985_v48 = vld [vmem:[#allocation16_spill] sm:$0xff] }
 0x34f   :  { %1069 = vbcast.lane.b32.xlu1 %v3238_v61, 264  ;;  %1054 = vbcast.lane.b32.xlu0 %v3243_v55, 256 }
 0x353   :  { %1080 = vbcast.lane.b32.xlu1 %v3227_v51, 264  ;;  %1065 = vbcast.lane.b32.xlu0 %v3238_v61, 256  ;;  %v3987_v61 = vmov 0.0|0.0  }
 0x357   :  { %1091 = vbcast.lane.b32.xlu1 %v3201_v34, 264  ;;  %1076 = vbcast.lane.b32.xlu0 %v3227_v51, 256 }
 0x35b   :  { %1102 = vbcast.lane.b32.xlu1 %v3983_v62, 264  ;;  %1087 = vbcast.lane.b32.xlu0 %v3201_v34, 256 }
 0x35f   :  { %1113 = vbcast.lane.b32.xlu1 %v3984_v49, 264  ;;  %1098 = vbcast.lane.b32.xlu0 %v3983_v62, 256  ;;  %v3989_v62 = vld [vmem:[#allocation9_spill] sm:$0xff] }
 0x363   :  { %1124 = vbcast.lane.b32.xlu1 %v3985_v48, 264  ;;  %1109 = vbcast.lane.b32.xlu0 %v3984_v49, 256  ;;  %v541_v49 = vadd.f32 %v3989_v62, %v3716_v20  ;;  %v3991_v62 = vld [vmem:[#allocation37_spill] sm:$0xff] }
 0x367   :  { %1135 = vbcast.lane.b32.xlu1 %v3986_v2, 264  ;;  %1120 = vbcast.lane.b32.xlu0 %v3985_v48, 256 }
 0x36b   :  { %1131 = vbcast.lane.b32.xlu0 %v3986_v2, 256 }
 0x36e   :  { %v2582_v3 = vpop.permute.xlu1 %2581 }
 0x36f   :  { %v2584_v16 = vunpack.i.h.bf16 %v2582_v3  ;;  %v2583_v29 = vunpack.i.l.bf16 %v2582_v3  ;;  %v3725_v3 = vld [vmem:[%s3890_s4 + $0x11] sm:$0xff] }
 0x371   :  { %v2577_v59 = vpop.permute.xlu0 %2576  ;;  %v2483_v55 = vpack.c.bf16 %v2584_v16, %v2583_v29 }
 0x372   :  { %v2579_v0 = vunpack.i.h.bf16 %v2577_v59  ;;  %v2578_v10 = vunpack.i.l.bf16 %v2577_v59  ;;  %v2592_v50 = vpop.permute.xlu1 %2591  ;;  %v1539_v59 = vmul.f32 %v3725_v3, %v541_v49 }
 0x373   :  { %v2594_v11 = vunpack.i.h.bf16 %v2592_v50  ;;  %v2593_v53 = vunpack.i.l.bf16 %v2592_v50 }
 0x374   :  { %v2480_v34 = vpack.c.bf16 %v2579_v0, %v2578_v10 }
 0x375   :  { %v2587_v51 = vpop.permute.xlu0 %2586  ;;  %v2489_v35 = vpack.c.bf16 %v2594_v11, %v2593_v53 }
 0x376   :  { %2481 = vmatpush3.bf16.msra.mxu0 %v2480_v34  ;;  %v2589_v36 = vunpack.i.h.bf16 %v2587_v51  ;;  %v2588_v21 = vunpack.i.l.bf16 %v2587_v51  ;;  %v2602_v5 = vpop.permute.xlu1 %2601 }
 0x377   :  { %2482 = vmatprep.subr.bf16.mxu0 %v3987_v61  ;;  %v2604_v9 = vunpack.i.h.bf16 %v2602_v5  ;;  %v2603_v46 = vunpack.i.l.bf16 %v2602_v5 }
 0x378   :  { %v2486_v45 = vpack.c.bf16 %v2589_v36, %v2588_v21 }
 0x379   :  { %v2597_v37 = vpop.permute.xlu0 %2596  ;;  %v2495_v57 = vpack.c.bf16 %v2604_v9, %v2603_v46 }
 0x37a   :  { %2484 = vmatpush3.bf16.msra.mxu0 %v2483_v55  ;;  %v2599_v25 = vunpack.i.h.bf16 %v2597_v37  ;;  %v2598_v43 = vunpack.i.l.bf16 %v2597_v37  ;;  %v2612_v54 = vpop.permute.xlu1 %2611 }
 0x37b   :  { %2485 = vmatprep.subr.bf16.mxu0 %v3987_v61  ;;  %v2614_v44 = vunpack.i.h.bf16 %v2612_v54  ;;  %v2613_v52 = vunpack.i.l.bf16 %v2612_v54 }
 0x37c   :  { %v2492_v26 = vpack.c.bf16 %v2599_v25, %v2598_v43 }
 0x37d   :  { %v2607_v1 = vpop.permute.xlu0 %2606  ;;  %v2501_v48 = vpack.c.bf16 %v2614_v44, %v2613_v52 }
 0x37e   :  { %2487 = vmatpush3.bf16.msra.mxu0 %v2486_v45  ;;  %v2609_v40 = vunpack.i.h.bf16 %v2607_v1  ;;  %v2608_v23 = vunpack.i.l.bf16 %v2607_v1  ;;  %v3990_v1 = vld [vmem:[#allocation30_spill] sm:$0xff] }
 0x37f   :  { %2488 = vmatprep.subr.bf16.mxu0 %v3987_v61 }
 0x380   :  { %v2498_v6 = vpack.c.bf16 %v2609_v40, %v2608_v23 }
 0x382   :  { %2490 = vmatpush3.bf16.msra.mxu0 %v2489_v35 }
 0x383   :  { %2491 = vmatprep.subr.bf16.mxu0 %v3987_v61 }
 0x386   :  { %2493 = vmatpush3.bf16.msra.mxu0 %v2492_v26  ;;  %v1410_v26 = vmul.f32 0.0, %v3506_v24 }
 0x387   :  { %2494 = vmatprep.subr.bf16.mxu0 %v3987_v61 }
 0x38a   :  { %2496 = vmatpush3.bf16.msra.mxu0 %v2495_v57  ;;  %v1409_v57 = vmul.f32 0.0, %v3990_v1 }
 0x38b   :  { %2497 = vmatprep.subr.bf16.mxu0 %v3987_v61 }
 0x38d   :  { %v2622_v2 = vpop.permute.xlu1 %2621 }
 0x38e   :  { %2499 = vmatpush3.bf16.msra.mxu0 %v2498_v6  ;;  %v2624_v34 = vunpack.i.h.bf16 %v2622_v2  ;;  %v2623_v51 = vunpack.i.l.bf16 %v2622_v2 }
 0x38f   :  { %2500 = vmatprep.subr.bf16.mxu0 %v3987_v61 }
 0x390   :  { %v2531_v50 = vpack.c.bf16 %v2624_v34, %v2623_v51 }
 0x391   :  { %v2632_v0 = vpop.permute.xlu1 %2631  ;;  %v2617_v10 = vpop.permute.xlu0 %2616 }
 0x392   :  { %2502 = vmatpush3.bf16.msra.mxu0 %v2501_v48  ;;  %v2619_v16 = vunpack.i.h.bf16 %v2617_v10  ;;  %v2618_v29 = vunpack.i.l.bf16 %v2617_v10  ;;  %v2634_v35 = vunpack.i.h.bf16 %v2632_v0  ;;  %v2633_v25 = vunpack.i.l.bf16 %v2632_v0 }
 0x393   :  { %2527 = vmatprep.subr.bf16.mxu0 %v3987_v61 }
 0x394   :  { %v2528_v55 = vpack.c.bf16 %v2619_v16, %v2618_v29  ;;  %v2537_v23 = vpack.c.bf16 %v2634_v35, %v2633_v25  ;;  %v3993_v29 = vld [vmem:[#allocation41_spill] sm:$0xff]  ;;  %v3995_v25 = vld [vmem:[#allocation39_spill] sm:$0xff] }
 0x395   :  { %2292 = vmatmul.mubr.f32.vlgmr.msra.gmra.mrb[6].mxu0 %v1539_v59  ;;  %v2642_v36 = vpop.permute.xlu1 %2641  ;;  %v2627_v21 = vpop.permute.xlu0 %2626 }
 0x396   :  { %2361 = vmatprep.mubr.msk.f32.mxu0 %vm2773_vm12, %v3982_v22  ;;  %2529 = vmatpush3.bf16.msra.mxu0 %v2528_v55  ;;  %v2629_v11 = vunpack.i.h.bf16 %v2627_v21  ;;  %v2628_v53 = vunpack.i.l.bf16 %v2627_v21  ;;  %v2644_v24 = vunpack.i.h.bf16 %v2642_v36  ;;  %v2643_v2 = vunpack.i.l.bf16 %v2642_v36 }
 0x397   :  { %2530 = vmatprep.subr.bf16.mxu0 %v3987_v61 }
 0x398   :  { %v2534_v43 = vpack.c.bf16 %v2629_v11, %v2628_v53  ;;  %v2543_v21 = vpack.c.bf16 %v2644_v24, %v2643_v2  ;;  %v3994_v53 = vld [vmem:[#allocation35_spill] sm:$0xff]  ;;  %v3999_v24 = vld [vmem:[#allocation33_spill] sm:$0xff] }
 0x399   :  { %v971_v45 = vpop.permute.xlu1 %970  ;;  %v2637_v37 = vpop.permute.xlu0 %2636 }
 0x39a   :  { %2532 = vmatpush3.bf16.msra.mxu0 %v2531_v50  ;;  %v1218_v5 = vmul.f32 %v3497_v33, %v971_v45  ;;  %v2639_v39 = vunpack.i.h.bf16 %v2637_v37  ;;  %v2638_v13 = vunpack.i.l.bf16 %v2637_v37 }
 0x39b   :  { %2533 = vmatprep.subr.bf16.mxu0 %v3987_v61 }
 0x39c   :  { %v1414_v54 = vadd.f32 %v1410_v26, %v1218_v5  ;;  %v2540_v59 = vpack.c.bf16 %v2639_v39, %v2638_v13 }
 0x39d   :  { %v978_v9 = vpop.permute.xlu1 %977  ;;  %v967_v46 = vpop.permute.xlu0 %966 }
 0x39e   :  { %v1217_v40 = vmul.f32 %v3497_v33, %v967_v46  ;;  %2535 = vmatpush3.bf16.msra.mxu0 %v2534_v43  ;;  %v3992_v33 = vld [vmem:[#allocation38_spill] sm:$0xff]  ;;  %v1426_v34 = vmul.f32 %v3993_v29, %v1414_v54 }
 0x39f   :  { %2536 = vmatprep.subr.bf16.mxu0 %v3987_v61  ;;  %v1219_v0 = vmul.f32 %v3992_v33, %v978_v9  ;;  %v3996_v9 = vld [vmem:[#allocation34_spill] sm:$0xff] }
 0x3a0   :  { %v1413_v44 = vadd.f32 %v1409_v57, %v1217_v40 }
 0x3a1   :  { %v2652_v52 = vpop.permute.xlu1 %2651  ;;  %v2647_v6 = vpop.permute.xlu0 %2646 }
 0x3a2   :  { %v1425_v49 = vmul.f32 %v3991_v62, %v1413_v44  ;;  %v2456_v48 = vpack.c.bf16 %v1414_v54, %v1413_v44  ;;  %2538 = vmatpush3.bf16.msra.mxu0 %v2537_v23  ;;  %v2649_v50 = vunpack.i.h.bf16 %v2647_v6  ;;  %v2648_v11 = vunpack.i.l.bf16 %v2647_v6  ;;  %v3997_v44 = vld [vmem:[#allocation32_spill] sm:$0xff] }
 0x3a3   :  { %2539 = vmatprep.subr.bf16.mxu0 %v3987_v61  ;;  %v2654_v1 = vunpack.i.h.bf16 %v2652_v52  ;;  %v2653_v57 = vunpack.i.l.bf16 %v2652_v52  ;;  %v3998_v62 = vld [vmem:[#allocation36_spill] sm:$0xff] }
 0x3a4   :  { %2457 = vmatpush3.bf16.msra.mxu1 %v2456_v48  ;;  %v1429_v51 = vadd.f32 %v1425_v49, %v1219_v0  ;;  %v2546_v40 = vpack.c.bf16 %v2649_v50, %v2648_v11 }
 0x3a5   :  { %v993_v10 = vpop.permute.xlu1 %992  ;;  %v982_v16 = vpop.permute.xlu0 %981  ;;  %2458 = vmatprep.subr.bf16.mxu1 %v3987_v61  ;;  %v2549_v0 = vpack.c.bf16 %v2654_v1, %v2653_v57 }
 0x3a6   :  { %v1220_v55 = vmul.f32 %v3992_v33, %v982_v16  ;;  %2541 = vmatpush3.bf16.msra.mxu0 %v2540_v59  ;;  %v1222_v45 = vmul.f32 %v3994_v53, %v993_v10  ;;  %v1441_v46 = vmul.f32 %v3996_v9, %v1429_v51  ;;  %v4000_v59 = vld [vmem:[#allocation12_spill] sm:$0xff] }
 0x3a7   :  { %2542 = vmatprep.subr.bf16.mxu0 %v3987_v61  ;;  %v547_v33 = vadd.f32 %v4000_v59, %v3716_v20  ;;  %v4009_v59 = vld [vmem:[#allocation23_spill] sm:$0xff] }
 0x3a8   :  { %v1430_v36 = vadd.f32 %v1426_v34, %v1220_v55 }
 0x3a9   :  { %v1004_v37 = vpop.permute.xlu1 %1003  ;;  %v989_v35 = vpop.permute.xlu0 %988  ;;  %v1540_v20 = vmul.f32 %v3725_v3, %v547_v33 }
 0x3aa   :  { %v1442_v43 = vmul.f32 %v3995_v25, %v1430_v36  ;;  %v2459_v5 = vpack.c.bf16 %v1430_v36, %v1429_v51  ;;  %v1221_v26 = vmul.f32 %v3994_v53, %v989_v35  ;;  %2544 = vmatpush3.bf16.msra.mxu0 %v2543_v21  ;;  %v1224_v6 = vmul.f32 %v3997_v44, %v1004_v37  ;;  %v4001_v51 = vld [vmem:[#allocation28_spill] sm:$0xff]  ;;  %v4002_v21 = vld [vmem:[#allocation31_spill] sm:$0xff] }
 0x3ab   :  { %2545 = vmatprep.subr.bf16.mxu0 %v3987_v61  ;;  %v4003_v53 = vld [vmem:[#allocation27_spill] sm:$0xff] }
 0x3ac   :  { %v1446_v23 = vadd.f32 %v1442_v43, %v1222_v45  ;;  %v1445_v54 = vadd.f32 %v1441_v46, %v1221_v26  ;;  %2460 = vmatpush3.bf16.msra.mxu1 %v2459_v5  ;;  %v4004_v5 = vld [vmem:[#allocation25_spill] sm:$0xff] }
 0x3ad   :  { %v1015_v39 = vpop.permute.xlu1 %1014  ;;  %v1000_v13 = vpop.permute.xlu0 %999  ;;  %2461 = vmatprep.subr.bf16.mxu1 %v3987_v61  ;;  %v4005_v46 = vld [vmem:[#allocation29_spill] sm:$0xff] }
 0x3ae   :  { %v1458_v49 = vmul.f32 %v3998_v62, %v1446_v23  ;;  %v2462_v48 = vpack.c.bf16 %v1446_v23, %v1445_v54  ;;  %v1457_v2 = vmul.f32 %v3999_v24, %v1445_v54  ;;  %2547 = vmatpush3.bf16.msra.mxu0 %v2546_v40  ;;  %v1223_v52 = vmul.f32 %v3997_v44, %v1000_v13  ;;  %v4006_v40 = vld [vmem:[#allocation24_spill] sm:$0xff] }
 0x3af   :  { %2548 = vmatprep.subr.bf16.mxu0 %v3987_v61  ;;  %v1226_v55 = vmul.f32 %v4001_v51, %v1015_v39 }
 0x3b0   :  { %v1462_v10 = vadd.f32 %v1458_v49, %v1224_v6  ;;  %2463 = vmatpush3.bf16.msra.mxu1 %v2462_v48  ;;  %v1461_v16 = vadd.f32 %v1457_v2, %v1223_v52  ;;  %v4007_v6 = vld [vmem:[#allocation22_spill] sm:$0xff] }
 0x3b1   :  { %v1026_v29 = vpop.permute.xlu1 %1025  ;;  %v1011_v34 = vpop.permute.xlu0 %1010  ;;  %2464 = vmatprep.subr.bf16.mxu1 %v3987_v61  ;;  %v4008_v49 = vld [vmem:[#allocation26_spill] sm:$0xff] }
 0x3b2   :  { %v1474_v50 = vmul.f32 %v4002_v21, %v1462_v10  ;;  %v1225_v11 = vmul.f32 %v4001_v51, %v1011_v34  ;;  %2550 = vmatpush3.bf16.msra.mxu0 %v2549_v0  ;;  %v2465_v36 = vpack.c.bf16 %v1462_v10, %v1461_v16  ;;  %v1473_v45 = vmul.f32 %v4003_v53, %v1461_v16  ;;  %v4010_v34 = vld [vmem:[#allocation20_spill] sm:$0xff] }
 0x3b3   :  { %v1228_v9 = vmul.f32 %v4004_v5, %v1026_v29  ;;  %v1412_v10 = vmul.f32 0.0, %v3656_v38 }
 0x3b4   :  { %v1478_v37 = vadd.f32 %v1474_v50, %v1226_v55  ;;  %v1477_v35 = vadd.f32 %v1473_v45, %v1225_v11  ;;  %2466 = vmatpush3.bf16.msra.mxu1 %v2465_v36  ;;  %v4011_v55 = vld [vmem:[#allocation21_spill] sm:$0xff]  ;;  %v4012_v36 = vld [vmem:[#allocation19_spill] sm:$0xff] }
 0x3b5   :  { %v1037_v25 = vpop.permute.xlu1 %1036  ;;  %v1022_v43 = vpop.permute.xlu0 %1021  ;;  %2362 = vmatmul.mubr.f32.vlgmr.msra.gmra.mrb[8].mxu0 %v1540_v20  ;;  %2467 = vmatprep.subr.bf16.mxu1 %v3987_v61 }
 0x3b6   :  { %v1490_v26 = vmul.f32 %v4005_v46, %v1478_v37  ;;  %v1227_v1 = vmul.f32 %v4004_v5, %v1022_v43  ;;  %v2468_v57 = vpack.c.bf16 %v1478_v37, %v1477_v35  ;;  %v1489_v23 = vmul.f32 %v4006_v40, %v1477_v35  ;;  %v4013_v35 = vld [vmem:[#allocation11_spill] sm:$0xff] }
 0x3b7   :  { %v1230_v62 = vmul.f32 %v4007_v6, %v1037_v25  ;;  %v4014_v25 = vld [vmem:[#allocation10_spill] sm:$0xff] }
 0x3b8   :  { %v1494_v54 = vadd.f32 %v1490_v26, %v1228_v9  ;;  %v1493_v39 = vadd.f32 %v1489_v23, %v1227_v1  ;;  %2469 = vmatpush3.bf16.msra.mxu1 %v2468_v57  ;;  %v466_v38 = vadd.f32 %v4014_v25, %v4013_v35  ;;  %v1411_v1 = vmul.f32 0.0, %v3652_v4 }
 0x3b9   :  { %v1048_v13 = vpop.permute.xlu1 %1047  ;;  %v1033_v44 = vpop.permute.xlu0 %1032  ;;  %2470 = vmatprep.subr.bf16.mxu1 %v3987_v61 }
 0x3ba   :  { %v1506_v48 = vmul.f32 %v4008_v49, %v1494_v54  ;;  %v1229_v24 = vmul.f32 %v4007_v6, %v1033_v44  ;;  %v2471_v2 = vpack.c.bf16 %v1494_v54, %v1493_v39  ;;  %v1505_v33 = vmul.f32 %v4009_v59, %v1493_v39 }
 0x3bb   :  { %v1232_v51 = vmul.f32 %v4010_v34, %v1048_v13  ;;  %v1537_v39 = vmul.f32 %v3725_v3, %v466_v38 }
 0x3bc   :  { %v1510_v52 = vadd.f32 %v1506_v48, %v1230_v62  ;;  %v1509_v0 = vadd.f32 %v1505_v33, %v1229_v24  ;;  %2472 = vmatpush3.bf16.msra.mxu1 %v2471_v2 }
 0x3bd   :  { %v1059_v16 = vpop.permute.xlu1 %1058  ;;  %v1044_v29 = vpop.permute.xlu0 %1043  ;;  %2473 = vmatprep.subr.bf16.mxu1 %v3987_v61 }
 0x3be   :  { %v1522_v21 = vmul.f32 %v4011_v55, %v1510_v52  ;;  %v1234_v50 = vmul.f32 %v3644_v17, %v1059_v16  ;;  %v1231_v11 = vmul.f32 %v4010_v34, %v1044_v29  ;;  %v2474_v20 = vpack.c.bf16 %v1510_v52, %v1509_v0 }
 0x3bf   :  { %v1521_v53 = vmul.f32 %v4012_v36, %v1509_v0 }
 0x3c0   :  { %v1526_v45 = vadd.f32 %v1522_v21, %v1232_v51  ;;  %v1416_v37 = vadd.f32 %v1412_v10, %v1234_v50  ;;  %2475 = vmatpush3.bf16.msra.mxu1 %v2474_v20 }
 0x3c1   :  { %v1525_v43 = vadd.f32 %v1521_v53, %v1231_v11  ;;  %v1070_v5 = vpop.permute.xlu1 %1069  ;;  %v1055_v9 = vpop.permute.xlu0 %1054  ;;  %2476 = vmatprep.subr.bf16.mxu1 %v3987_v61 }
 0x3c2   :  { %v1428_v46 = vmul.f32 %v3640_v32, %v1416_v37  ;;  %v1236_v26 = vmul.f32 %v3630_v8, %v1070_v5  ;;  %v1233_v57 = vmul.f32 %v3644_v17, %v1055_v9 }
 0x3c3   :  { %v2477_v40 = vpack.c.bf16 %v1526_v45, %v1525_v43 }
 0x3c4   :  { %v1432_v23 = vadd.f32 %v1428_v46, %v1236_v26  ;;  %v1415_v54 = vadd.f32 %v1411_v1, %v1233_v57 }
 0x3c5   :  { %2478 = vmatpush3.bf16.msra.mxu1 %v2477_v40  ;;  %v1081_v13 = vpop.permute.xlu1 %1080  ;;  %v1066_v44 = vpop.permute.xlu0 %1065 }
 0x3c6   :  { %v2504_v6 = vpack.c.bf16 %v1416_v37, %v1415_v54  ;;  %v1444_v62 = vmul.f32 %v3636_v19, %v1432_v23  ;;  %v1238_v32 = vmul.f32 %v3614_v12, %v1081_v13  ;;  %v1427_v49 = vmul.f32 %v3632_v58, %v1415_v54  ;;  %2503 = vmatprep.subr.bf16.mxu1 %v3987_v61 }
 0x3c7   :  { %v1235_v17 = vmul.f32 %v3630_v8, %v1066_v44 }
 0x3c8   :  { %v1448_v4 = vadd.f32 %v1444_v62, %v1238_v32  ;;  %2257 = vmatmul.mubr.f32.vlgmr.msra.gmra.mrb[4].mxu1 %v1537_v39 }
 0x3c9   :  { %v1431_v48 = vadd.f32 %v1427_v49, %v1235_v17  ;;  %2505 = vmatpush3.bf16.msra.mxu1 %v2504_v6  ;;  %v1092_v24 = vpop.permute.xlu1 %1091  ;;  %v1077_v3 = vpop.permute.xlu0 %1076  ;;  %2326 = vmatprep.mubr.msk.f32.mxu1 %vm2773_vm12, %v3982_v22  ;;  %v4018_v17 = vld [vmem:[#allocation5_spill] sm:$0xff] }
 0x3ca   :  { %v1460_v2 = vmul.f32 %v3623_v30, %v1448_v4  ;;  %v1240_v19 = vmul.f32 %v3586_v18, %v1092_v24  ;;  %v1237_v59 = vmul.f32 %v3614_v12, %v1077_v3  ;;  %2506 = vmatprep.subr.bf16.mxu1 %v3987_v61 }
 0x3cb   :  { %v2507_v58 = vpack.c.bf16 %v1432_v23, %v1431_v48  ;;  %v1443_v8 = vmul.f32 %v3611_v15, %v1431_v48  ;;  %v4016_v23 = vld [vmem:[#allocation40_spill] sm:$0xff] }
 0x3cc   :  { %v1464_v33 = vadd.f32 %v1460_v2, %v1240_v19  ;;  %v2125_v19 = vld [vmem:[%s3890_s4 + $0x10] ss:$0 sm:$0xff] }
 0x3cd   :  { %v1447_v52 = vadd.f32 %v1443_v8, %v1237_v59  ;;  %2508 = vmatpush3.bf16.msra.mxu1 %v2507_v58  ;;  %v1103_v0 = vpop.permute.xlu1 %1102  ;;  %v1088_v10 = vpop.permute.xlu0 %1087  ;;  %v2001_v59 = vld [vmem:[%s3891_s5] sm:$0xff]  ;;  %v2002_v58 = vld [vmem:[%s3891_s5 + $0x8] sm:$0xff]  ;;  %v2003_v8 = vld [vmem:[%s3891_s5 + $0x10] sm:$0xff] }
 0x3ce   :  { %v1476_v16 = vmul.f32 %v3605_v47, %v1464_v33  ;;  %v1242_v22 = vmul.f32 %v3563_v28, %v1103_v0  ;;  %v1239_v30 = vmul.f32 %v3586_v18, %v1088_v10  ;;  %2509 = vmatprep.subr.bf16.mxu1 %v3987_v61  ;;  %v2005_v10 = vld [vmem:[%s3891_s5 + $0x20] sm:$0xff] }
 0x3cf   :  { %v2510_v29 = vpack.c.bf16 %v1448_v4, %v1447_v52  ;;  %v1459_v12 = vmul.f32 %v3590_v56, %v1447_v52  ;;  %v1977_v4 = vsub.f32 0.0, %v4018_v17  ;;  %v2004_v52 = vld [vmem:[%s3891_s5 + $0x18] sm:$0xff] }
 0x3d0   :  { %v1480_v34 = vadd.f32 %v1476_v16, %v1242_v22  ;;  %v2555_v0 = vpack.c.bf16 %v2004_v52, %v2003_v8  ;;  %v2006_v16 = vld [vmem:[%s3891_s5 + $0x28] sm:$0xff]  ;;  %v4019_v22 = vld [vmem:[#allocation7_spill] sm:$0xff] }
 0x3d1   :  { %v1463_v51 = vadd.f32 %v1459_v12, %v1239_v30  ;;  %2511 = vmatpush3.bf16.msra.mxu1 %v2510_v29  ;;  %v1114_v15 = vpop.permute.xlu1 %1113  ;;  %v1099_v55 = vpop.permute.xlu0 %1098  ;;  %v1979_v48 = vmul.f32 1.442695, %v1977_v4  ;;  %v1963_v30 = vmul.f32 %v2125_v19, %v4019_v22 }
 0x3d2   :  { %v1492_v21 = vmul.f32 %v3579_v14, %v1480_v34  ;;  %v1244_v50 = vmul.f32 %v3537_v63, %v1114_v15  ;;  %v1241_v47 = vmul.f32 %v3563_v28, %v1099_v55  ;;  %2512 = vmatprep.subr.bf16.mxu1 %v3987_v61  ;;  %v4020_v55 = vld [vmem:[#allocation6_spill] sm:$0xff] }
 0x3d3   :  { %v2513_v11 = vpack.c.bf16 %v1464_v33, %v1463_v51  ;;  %v1475_v18 = vmul.f32 %v3557_v41, %v1463_v51  ;;  %2735 = vpow2.f32 %v1979_v48  ;;  %v2551_v33 = vpack.c.bf16 %v2002_v58, %v2001_v59 }
 0x3d4   :  { %v1496_v20 = vadd.f32 %v1492_v21, %v1244_v50  ;;  %v2559_v51 = vpack.c.bf16 %v2006_v16, %v2005_v10  ;;  %v1978_v21 = vsub.f32 0.0, %v4020_v55 }
 0x3d5   :  { %v1479_v36 = vadd.f32 %v1475_v18, %v1241_v47  ;;  %2514 = vmatpush3.bf16.msra.mxu1 %v2513_v11  ;;  %v1125_v56 = vpop.permute.xlu1 %1124  ;;  %v1110_v53 = vpop.permute.xlu0 %1109 }
 0x3d6   :  { %v1508_v45 = vmul.f32 %v3551_v60, %v1496_v20  ;;  %v1246_v37 = vmul.f32 %v3509_v7, %v1125_v56  ;;  %v1243_v14 = vmul.f32 %v3537_v63, %v1110_v53  ;;  %2515 = vmatprep.subr.bf16.mxu1 %v3987_v61  ;;  %v4015_v60 = vld [vmem:[#allocation42_spill] sm:$0xff]  ;;  %v1981_v47 = vmul.f32 1.442695, %v1978_v21  ;;  %v4021_v53 = vld [vmem:[#allocation8_spill] sm:$0xff] }
 0x3d7   :  { %v2516_v35 = vpack.c.bf16 %v1480_v34, %v1479_v36  ;;  %v1491_v28 = vmul.f32 %v3532_v27, %v1479_v36  ;;  %v2008_v36 = vld [vmem:[%s3891_s5 + $0x38] sm:$0xff] }
 0x3d8   :  { %v1512_v25 = vadd.f32 %v1508_v45, %v1246_v37  ;;  %v1964_v45 = vmul.f32 %v2125_v19, %v4021_v53 }
 0x3d9   :  { %v1495_v38 = vadd.f32 %v1491_v28, %v1243_v14  ;;  %2517 = vmatpush3.bf16.msra.mxu1 %v2516_v35  ;;  %v1121_v41 = vpop.permute.xlu0 %1120  ;;  %v1136_v43 = vpop.permute.xlu1 %1135 }
 0x3da   :  { %v1245_v5 = vmul.f32 %v3509_v7, %v1121_v41  ;;  %2518 = vmatprep.subr.bf16.mxu1 %v3987_v61  ;;  %v1524_v26 = vmul.f32 %v3526_v31, %v1512_v25  ;;  %v1248_v63 = vmul.f32 %v3487_v42, %v1136_v43  ;;  %v4017_v31 = vld [vmem:[#allocation13_spill] sm:$0xff] }
 0x3db   :  { %v2519_v9 = vpack.c.bf16 %v1496_v20, %v1495_v38  ;;  %v1507_v46 = vmul.f32 %v4015_v60, %v1495_v38  ;;  %v2007_v20 = vld [vmem:[%s3891_s5 + $0x30] sm:$0xff] }
 0x3dc   :  { %v1528_v7 = vadd.f32 %v1524_v26, %v1248_v63  ;;  %v2563_v56 = vpack.c.bf16 %v2008_v36, %v2007_v20  ;;  %v2126_v63 = vld [vmem:[%s3891_s5 + $0x40] ss:$0 sm:$0xff] }
 0x3dd   :  { %v1511_v1 = vadd.f32 %v1507_v46, %v1245_v5  ;;  %2520 = vmatpush3.bf16.msra.mxu1 %v2519_v9  ;;  %v1132_v57 = vpop.permute.xlu0 %1131 }
 0x3de   :  { %v1247_v27 = vmul.f32 %v3487_v42, %v1132_v57  ;;  %2521 = vmatprep.subr.bf16.mxu1 %v3987_v61 }
 0x3df   :  { %v2522_v40 = vpack.c.bf16 %v1512_v25, %v1511_v1  ;;  %v1523_v54 = vmul.f32 %v4016_v23, %v1511_v1 }
 0x3e1   :  { %v1527_v39 = vadd.f32 %v1523_v54, %v1247_v27  ;;  %2523 = vmatpush3.bf16.msra.mxu1 %v2522_v40 }
 0x3e2   :  { %2524 = vmatprep.subr.bf16.mxu1 %v3987_v61  ;;  %v2736_v61 = vpop.eup %2735 }
 0x3e3   :  { %v2525_v13 = vpack.c.bf16 %v1528_v7, %v1527_v39  ;;  %v1983_v2 = vadd.f32 1.0, %v2736_v61 }
 0x3e5   :  { %2526 = vmatpush3.bf16.msra.mxu1 %v2525_v13  ;;  %2737 = vrcp.f32 %v1983_v2 }
 0x3e6   :  { %2552 = vmatprep.subr.bf16.mxu1 %v2551_v33  ;;  %2739 = vpow2.f32 %v1981_v47 }
 0x3e8   :  { %2327 = vmatmul.mubr.f32.vlgmr.msra.gmra.mrb[6].mxu1 %v4017_v31 }
 0x3e9   :  { %2554 = vmatpush3.bf16.msra.mxu1 %v2551_v33 }
 0x3ea   :  { %2556 = vmatprep.subr.bf16.mxu1 %v2555_v0 }
 0x3ed   :  { %2558 = vmatpush3.bf16.msra.mxu1 %v2555_v0 }
 0x3ee   :  { %2560 = vmatprep.subr.bf16.mxu1 %v2559_v51 }
 0x3ef   :  { %v2738_v15 = vpop.eup %2737 }
 0x3f0   :  { %v1989_v50 = vmul.f32 %v2738_v15, %v4018_v17  ;;  %v2740_v11 = vpop.eup %2739 }
 0x3f1   :  { %2562 = vmatpush3.bf16.msra.mxu1 %v2559_v51  ;;  %v1984_v18 = vadd.f32 1.0, %v2740_v11 }
 0x3f2   :  { %2564 = vmatprep.subr.bf16.mxu1 %v2563_v56 }
 0x3f3   :  { %2741 = vrcp.f32 %v1984_v18 }
 0x3f5   :  { %2566 = vmatpush3.bf16.msra.mxu1 %v2563_v56 }
 0x3fd   :  { %v2742_v28 = vpop.eup %2741 }
 0x3fe   :  { %v1990_v25 = vmul.f32 %v2742_v28, %v4020_v55 }
 0x468   :  { %v1741_v44 = vpop.f32.mrb[6].mxu0 }
 0x469   :  { %1746 = vrot.lane.b32.xlu0 %v1741_v44, %s2769_s11  ;;  %v2293_v6 = vpop.f32.mrb[7].mxu0 }
 0x488   :  { %v1950_v62 = vpop.f32.mrb[8].mxu0 }
 0x489   :  { %1955 = vrot.lane.b32.xlu1 %v1950_v62, %s2769_s11  ;;  %v2363_v42 = vpop.f32.mrb[9].mxu0 }
 0x49b   :  { %v1607_v32 = vpop.f32.mrb[4].mxu1 }
 0x49c   :  { %v2258_v49 = vpop.f32.mrb[5].mxu1 }
 0x4bb   :  { %v1816_v24 = vpop.f32.mrb[6].mxu1 }
 0x4bc   :  { %v2328_v3 = vpop.f32.mrb[7].mxu1 }
 0x4db   :  { %v1747_v29 = vpop.permute.xlu0 %1746 }
 0x4dc   :  { %v1749_v12 = vsel %vm125_vm1, %v1607_v32, %v1747_v29 }
 0x4dd   :  { %v1965_v34 = vadd.f32 %v1963_v30, %v1749_v12 }
 0x4df   :  { %1969 = vrot.lane.b32.xlu0 %v1965_v34, %s2769_s11 }
 0x4e3   :  { %1993 = vrot.lane.b32.xlu0 %v1989_v50, %s2769_s11 }
 0x4fb   :  { %v1956_v37 = vpop.permute.xlu1 %1955 }
 0x4fc   :  { %v1958_v14 = vsel %vm125_vm1, %v1816_v24, %v1956_v37 }
 0x4fd   :  { %v1966_v35 = vadd.f32 %v1964_v45, %v1958_v14 }
 0x4ff   :  { %1971 = vrot.lane.b32.xlu1 %v1966_v35, %s2769_s11 }
 0x503   :  { %1995 = vrot.lane.b32.xlu1 %v1990_v25, %s2769_s11  ;;  %s2745_s11 = scalar_lea.vmem %s2103_s9, 256 }
 0x504   :  { %p2746_p0 = scmp.ne.s32.totalorder %s2103_s9, %s2745_s11  ;;  %p2751_p2 = scmp.lt.s32.totalorder %s2745_s11, %s2745_s11 }
 0x506   :  { %p2752_p3 = por %p2751_p2, %p2750_p1 }
 0x508   :  { %p2753_p4 = pnand %p2752_p3, %p2746_p0 }
 0x551   :  { %v1970_v38 = vpop.permute.xlu0 %1969 }
 0x552   :  { %v1975_v41 = vadd.f32 %v1970_v38, %v1965_v34 }
 0x555   :  { %v1994_v43 = vpop.permute.xlu0 %1993 }
 0x556   :  { %v1999_v5 = vmul.f32 %v1994_v43, %v1975_v41 }
 0x558   :  { %2380 = vmatprep.mubr.msk.f32.mxu1 %vm125_vm1, %v1999_v5 }
 0x571   :  { %v1972_v9 = vpop.permute.xlu1 %1971 }
 0x572   :  { %v1976_v60 = vadd.f32 %v1972_v9, %v1966_v35 }
 0x575   :  { %v1996_v46 = vpop.permute.xlu1 %1995 }
 0x576   :  { %v2000_v26 = vmul.f32 %v1996_v46, %v1976_v60 }
 0x578   :  { %2381 = vmatmul.mubr.msk.f32.vlgmr.msra.gmra.mrb[8].mxu1 %vm125_vm1, %v2000_v26 }
 0x64b   :  { %v2382_v1 = vpop.f32.mrb[8].mxu1 }
 0x64c   :  { %v2092_v57 = vadd.f32 %v2382_v1, %v2126_v63  ;;  %v2086_v27 = vpop.f32.mrb[9].mxu1 }
 0x64d   :  { %v2087_v40 = vadd.f32 %v2126_v63, %v2086_v27 }
 0x64e   :  { %2096 = vst.msk [vmem:[#allocation2 + $0x8] sm:$0xff] %vm35_vm0, %v2092_v57 }
 0x64f   :  { %2095 = vst.msk [vmem:[#allocation2] sm:$0xff] %vm35_vm0, %v2087_v40 }
 0x650   :  { %2756 = shalt.err (!%p2753_p4)
}
 0x651   :  { %s2757_s0 = scalar_lea.hbm %s3892_s6, 256 }
 0x652   :  { %p2758_p5 = scmp.ne.s32.totalorder %s3892_s6, %s2757_s0  ;;  %p2761_p6 = scmp.lt.u32.totalorder %s2757_s0, %s3892_s6 }
 0x654   :  { %p2763_p7 = pnand %p2761_p6, %p2758_p5 }
 0x656   :  { %2766 = shalt.err (!%p2763_p7)
}
 0x657   :  { %s2775_s3 = smov 128   ;;  %s2776_s15 = smov 8  }
 0x658   :  { %2108 = dma.vmem_to_hbm [thread:$0]  %s2103_s9, 256, %s3892_s6, [#allocation3], %s2775_s3, %s2775_s3, %s2776_s15  }
 0x659   :  { %2767 = dma.done.wait [#allocation3], 256  }
 0x65a   :  { %2768 = vsyncadd [#allocation3], 4294967040 }
 0x65b   :  { %2112 = vsyncpa [#allocation3], 1 }

</bundles_post_ra>
